<compile_context>
chip_gen: v6e
topology: v6e:2x2x1
jax: 0.10.0
libtpu: 0.0.40
codegen_flags: <defaults>
</compile_context>

<pallas_src>
import functools

import jax
import jax.numpy as jnp
from jax.experimental import pallas as pl
from jax.experimental.pallas import tpu as pltpu

BN_EPS = 1e-5
VGG_SPECS = {
    "vgg11": ([1, 1, 2, 2, 2], [64, 128, 256, 512, 512]),
    "vgg13": ([2, 2, 2, 2, 2], [64, 128, 256, 512, 512]),
    "vgg16": ([2, 2, 3, 3, 3], [64, 128, 256, 512, 512]),
    "vgg19": ([2, 2, 4, 4, 4], [64, 128, 256, 512, 512]),
}


def _round_up(x, m):
    return (x + m - 1) // m * m


def _pick_tile(dim, target, mult):
    """Largest multiple of `mult` that divides `dim` and is <= target (else `dim`)."""
    t = (min(target, dim) // mult) * mult
    while t >= mult:
        if dim % t == 0:
            return t
        t -= mult
    return dim


# --------------------------------------------------------------------------------------
# ConvBlock pass 1: 3x3 conv (9 shifted bf16 matmuls, f32 accumulate) + BN batch stats
# --------------------------------------------------------------------------------------
def _conv_stats_kernel(x0_ref, x1_ref, x2_ref, w_ref, y_ref, sum_ref, ssq_ref):
    # x{d}_ref : (1, 1, W+2, C_in)     padded input row (h + d), bf16
    # w_ref    : (3, 3, C_in, C_out_p) bf16, resident across the grid
    # y_ref    : (1, 1, W, C_out_p)    pre-BN conv output row, f32
    # sum_ref  : (1, C_out_p) f32      resident per-channel sum accumulator
    # ssq_ref  : (1, C_out_p) f32      resident per-channel sum-of-squares accumulator
    first_step = jnp.logical_and(pl.program_id(0) == 0, pl.program_id(1) == 0)

    @pl.when(first_step)
    def _():
        sum_ref[...] = jnp.zeros_like(sum_ref)
        ssq_ref[...] = jnp.zeros_like(ssq_ref)

    w_out = y_ref.shape[2]
    rows = (x0_ref, x1_ref, x2_ref)
    acc = jnp.zeros(y_ref.shape[2:], jnp.float32)            # (W, C_out_p) f32
    for dh in range(3):
        row = rows[dh][0, 0]                                  # (W+2, C_in) bf16
        for kw in range(3):
            acc += jnp.dot(row[kw:kw + w_out, :], w_ref[dh, kw],
                           preferred_element_type=jnp.float32)

    y_ref[0, 0] = acc
    sum_ref[...] += jnp.sum(acc, axis=0, keepdims=True)
    ssq_ref[...] += jnp.sum(acc * acc, axis=0, keepdims=True)


# --------------------------------------------------------------------------------------
# ConvBlock pass 2: y * scale + shift, ReLU (BN folded into one FMA per element)
# --------------------------------------------------------------------------------------
def _bn_relu_kernel(y_ref, scale_ref, shift_ref, o_ref):
    o_ref[...] = jnp.maximum(
        y_ref[...] * scale_ref[...] + shift_ref[...], 0.0).astype(o_ref.dtype)


@jax.jit
def convblock_forward(x_nhwc, w_oihw, gamma, beta):
    """Conv2d(3x3, s1, p1) -> BatchNorm2d (training batch stats) -> ReLU.

    x_nhwc : (N, H, W, C_in) bf16 NHWC activation (C_in may include zero padding).
    w_oihw : (C_out, C_in_true, 3, 3) f32 PyTorch-layout weight.
    Returns (N, H, W, C_out_p) bf16, C_out_p = round_up(C_out, 128); padded channels
    are zero.  Conv bias is omitted (cancelled exactly by training-mode BatchNorm).
    """
    n, h, w, c_in = x_nhwc.shape
    c_out = w_oihw.shape[0]
    c_out_p = _round_up(c_out, 128)

    # (C_out, C_in_true, 3, 3) -> (3, 3, C_in, C_out_p), zero-pad C_in/C_out, cast bf16.
    w_hwio = jnp.transpose(w_oihw, (2, 3, 1, 0))
    w_p = jnp.zeros((3, 3, c_in, c_out_p), jnp.float32)
    w_p = w_p.at[:, :, :w_hwio.shape[2], :c_out].set(w_hwio).astype(jnp.bfloat16)
    gamma_p = jnp.zeros((1, c_out_p), jnp.float32).at[0, :c_out].set(gamma)
    beta_p = jnp.zeros((1, c_out_p), jnp.float32).at[0, :c_out].set(beta)

    xp = jnp.pad(x_nhwc.astype(jnp.bfloat16), ((0, 0), (1, 1), (1, 1), (0, 0)))

    def row_spec(dh):  # one padded input row, element offset dh along H (block size 1)
        return pl.BlockSpec((1, 1, w + 2, c_in), lambda ni, hi: (ni, hi + dh, 0, 0))

    flops = 2 * n * h * w * 9 * c_in * c_out_p
    bytes_accessed = 3 * xp.size * 2 + w_p.size * 2 + n * h * w * c_out_p * 4

    y, s, ss = pl.pallas_call(
        _conv_stats_kernel,
        grid=(n, h),
        in_specs=[row_spec(0), row_spec(1), row_spec(2),
                  pl.BlockSpec((3, 3, c_in, c_out_p), lambda ni, hi: (0, 0, 0, 0))],
        out_specs=[pl.BlockSpec((1, 1, w, c_out_p), lambda ni, hi: (ni, hi, 0, 0)),
                   pl.BlockSpec((1, c_out_p), lambda ni, hi: (0, 0)),
                   pl.BlockSpec((1, c_out_p), lambda ni, hi: (0, 0))],
        out_shape=(jax.ShapeDtypeStruct((n, h, w, c_out_p), jnp.float32),
                   jax.ShapeDtypeStruct((1, c_out_p), jnp.float32),
                   jax.ShapeDtypeStruct((1, c_out_p), jnp.float32)),
        # Both grid axes revisit the resident stats accumulators -> must be "arbitrary".
        compiler_params=pltpu.CompilerParams(
            dimension_semantics=("arbitrary", "arbitrary")),
        cost_estimate=pl.CostEstimate(flops=flops, transcendentals=0,
                                      bytes_accessed=bytes_accessed),
    )(xp, xp, xp, w_p)

    # Finalize BN (training semantics, biased variance) and fold gamma/beta.
    m_total = n * h * w
    mean = s / m_total
    var = jnp.maximum(ss / m_total - mean * mean, 0.0)    # guard cancellation
    scale = gamma_p * jax.lax.rsqrt(var + BN_EPS)
    shift = beta_p - mean * scale

    y2d = y.reshape(m_total, c_out_p)                     # free reshape (leading dims)
    tm = _pick_tile(m_total, 512, 8)
    out = pl.pallas_call(
        _bn_relu_kernel,
        grid=(m_total // tm,),
        in_specs=[pl.BlockSpec((tm, c_out_p), lambda i: (i, 0)),
                  pl.BlockSpec((1, c_out_p), lambda i: (0, 0)),
                  pl.BlockSpec((1, c_out_p), lambda i: (0, 0))],
        out_specs=pl.BlockSpec((tm, c_out_p), lambda i: (i, 0)),
        out_shape=jax.ShapeDtypeStruct((m_total, c_out_p), jnp.bfloat16),
        compiler_params=pltpu.CompilerParams(dimension_semantics=("parallel",)),
    )(y2d, scale, shift)
    return out.reshape(n, h, w, c_out_p)


# --------------------------------------------------------------------------------------
# Linear + ReLU (tiled matmul, f32 VMEM accumulator, bf16 operands)
# --------------------------------------------------------------------------------------
def _linear_relu_kernel(x_ref, w_ref, b_ref, o_ref, acc_ref):
    @pl.when(pl.program_id(1) == 0)
    def _():
        acc_ref[...] = jnp.zeros_like(acc_ref)

    acc_ref[...] += jnp.dot(x_ref[...], w_ref[...], preferred_element_type=jnp.float32)

    @pl.when(pl.program_id(1) == pl.num_programs(1) - 1)
    def _():
        o_ref[...] = jnp.maximum(acc_ref[...] + b_ref[...], 0.0).astype(o_ref.dtype)


@jax.jit
def linear_relu(x, w, b):
    """ReLU((B, K) @ (K, N) + b); K/N zero-padded to multiples of 128."""
    bsz, k = x.shape
    n_out = w.shape[1]
    k_p = _round_up(k, 128)
    n_p = _round_up(n_out, 128)
    x_p = jnp.zeros((bsz, k_p), jnp.bfloat16).at[:, :k].set(x.astype(jnp.bfloat16))
    w_p = jnp.zeros((k_p, n_p), jnp.bfloat16).at[:k, :n_out].set(w.astype(jnp.bfloat16))
    b_p = jnp.zeros((1, n_p), jnp.float32).at[0, :n_out].set(b)
    tk = _pick_tile(k_p, 512, 128)
    tn = _pick_tile(n_p, 512, 128)
    out = pl.pallas_call(
        _linear_relu_kernel,
        grid=(n_p // tn, k_p // tk),
        in_specs=[pl.BlockSpec((bsz, tk), lambda j, kk: (0, kk)),
                  pl.BlockSpec((tk, tn), lambda j, kk: (kk, j)),
                  pl.BlockSpec((1, tn), lambda j, kk: (0, j))],
        out_specs=pl.BlockSpec((bsz, tn), lambda j, kk: (0, j)),
        out_shape=jax.ShapeDtypeStruct((bsz, n_p), jnp.float32),
        scratch_shapes=[pltpu.VMEM((bsz, tn), jnp.float32)],
        compiler_params=pltpu.CompilerParams(
            dimension_semantics=("parallel", "arbitrary")),
        cost_estimate=pl.CostEstimate(
            flops=2 * bsz * k_p * n_p, transcendentals=0,
            bytes_accessed=(bsz * k_p + k_p * n_p) * 2 + bsz * n_p * 4),
    )(x_p, w_p, b_p)
    return out[:, :n_out]


# --------------------------------------------------------------------------------------
# Network assembly
# --------------------------------------------------------------------------------------
def _maxpool2x2(x_nhwc):
    n, h, w, c = x_nhwc.shape
    return jnp.max(x_nhwc.reshape(n, h // 2, 2, w // 2, 2, c), axis=(2, 4))


def vgg_forward(x_nchw, params, net_type="vgg16"):
    layers, filters = VGG_SPECS[net_type]
    x = jnp.transpose(x_nchw, (0, 2, 3, 1)).astype(jnp.bfloat16)  # NHWC end-to-end
    idx = 0
    c_true = x_nchw.shape[1]
    for n_layers, n_filter in zip(layers, filters):
        for _ in range(n_layers):
            p = params["blocks"][idx]
            x = convblock_forward(x, p["w"], p["gamma"], p["beta"])
            c_true = n_filter
            idx += 1
        x = _maxpool2x2(x)            # MaxPool2d(2): XLA glue between Pallas blocks
    x = x[..., :c_true]               # drop channel padding (no-op when C % 128 == 0)
    b = x.shape[0]
    x = jnp.transpose(x, (0, 3, 1, 2)).reshape(b, -1)   # PyTorch .view flatten order
    x = linear_relu(x, params["fc1_w"], params["fc1_b"])
    # TODO(synk): nn.Dropout(0.5) is stochastic in train mode; applied as identity (eval).
    x = linear_relu(x, params["fc2_w"], params["fc2_b"])
    x = linear_relu(x, params["fc3_w"], params["fc3_b"])
    return x


def init_params(key, net_type="vgg16", imgsize=32, fc=10):
    layers, filters = VGG_SPECS[net_type]
    params = {"blocks": []}
    c_in = 3
    for n_layers, n_filter in zip(layers, filters):
        for _ in range(n_layers):
            key, kw, kb, kg, kbe = jax.random.split(key, 5)
            bound = 1.0 / (c_in * 9) ** 0.5
            params["blocks"].append(dict(
                w=jax.random.uniform(kw, (n_filter, c_in, 3, 3), jnp.float32,
                                     -bound, bound),
                b=jax.random.uniform(kb, (n_filter,), jnp.float32, -bound, bound),
                gamma=1.0 + 0.1 * jax.random.normal(kg, (n_filter,), jnp.float32),
                beta=0.1 * jax.random.normal(kbe, (n_filter,), jnp.float32)))
            c_in = n_filter
    hidden_hw = imgsize // (2 ** len(layers))
    dims = [hidden_hw * hidden_hw * filters[-1], 4096, 4096, fc]
    for i in range(3):
        key, kw, kb = jax.random.split(key, 3)
        bound = 1.0 / dims[i] ** 0.5
        params[f"fc{i + 1}_w"] = jax.random.uniform(
            kw, (dims[i], dims[i + 1]), jnp.float32, -bound, bound)
        params[f"fc{i + 1}_b"] = jax.random.uniform(
            kb, (dims[i + 1],), jnp.float32, -bound, bound)
    return params


# --------------------------------------------------------------------------------------
# Pure-JAX reference (same bf16 rounding points, includes the conv bias that BN cancels)
# --------------------------------------------------------------------------------------
def _ref_convblock(x_nhwc, w_oihw, b, gamma, beta):
    lhs = x_nhwc.astype(jnp.bfloat16)
    rhs = jnp.transpose(w_oihw, (2, 3, 1, 0)).astype(jnp.bfloat16)   # HWIO
    y = jax.lax.conv_general_dilated(
        lhs, rhs, (1, 1), ((1, 1), (1, 1)),
        dimension_numbers=("NHWC", "HWIO", "NHWC"),
        preferred_element_type=jnp.float32)
    y = y + b.reshape(1, 1, 1, -1)
    mean = jnp.mean(y, axis=(0, 1, 2), keepdims=True)
    var = jnp.mean((y - mean) ** 2, axis=(0, 1, 2), keepdims=True)
    yn = (y - mean) * jax.lax.rsqrt(var + BN_EPS)
    yn = yn * gamma.reshape(1, 1, 1, -1) + beta.reshape(1, 1, 1, -1)
    return jnp.maximum(yn, 0.0)


@functools.partial(jax.jit, static_argnames=("net_type",))
def _ref_vgg_forward(x_nchw, params, net_type="vgg16"):
    layers, filters = VGG_SPECS[net_type]
    x = jnp.transpose(x_nchw, (0, 2, 3, 1))
    idx = 0
    for n_layers, _ in zip(layers, filters):
        for _ in range(n_layers):
            p = params["blocks"][idx]
            x = _ref_convblock(x, p["w"], p["b"], p["gamma"], p["beta"])
            idx += 1
        x = _maxpool2x2(x)
    b = x.shape[0]
    x = jnp.transpose(x, (0, 3, 1, 2)).reshape(b, -1)

    def lin(v, w, bias):
        y = jnp.dot(v.astype(jnp.bfloat16), w.astype(jnp.bfloat16),
                    preferred_element_type=jnp.float32) + bias
        return jnp.maximum(y, 0.0)

    x = lin(x, params["fc1_w"], params["fc1_b"])
    x = lin(x, params["fc2_w"], params["fc2_b"])
    x = lin(x, params["fc3_w"], params["fc3_b"])
    return x


if __name__ == "__main__":
    NET, IMG, FC_OUT, BATCH = "vgg16", 32, 10, 2
    root = jax.random.PRNGKey(0)
    kx, kp = jax.random.split(root)
    x = jax.random.normal(kx, (BATCH, 3, IMG, IMG), jnp.float32)
    params = init_params(kp, NET, IMG, FC_OUT)

    # --- single ConvBlock check (Pallas vs pure-JAX reference) ---
    blk = params["blocks"][0]
    x_nhwc = jnp.transpose(x, (0, 2, 3, 1)).astype(jnp.bfloat16)
    got_blk = jax.block_until_ready(
        convblock_forward(x_nhwc, blk["w"], blk["gamma"], blk["beta"]))
    ref_blk = _ref_convblock(jnp.transpose(x, (0, 2, 3, 1)), blk["w"], blk["b"],
                             blk["gamma"], blk["beta"])
    c0 = blk["w"].shape[0]
    assert got_blk.shape == (BATCH, IMG, IMG, 128), got_blk.shape
    blk_err = jnp.max(jnp.abs(got_blk[..., :c0].astype(jnp.float32) - ref_blk))
    assert jnp.allclose(got_blk[..., :c0].astype(jnp.float32), ref_blk,
                        atol=3e-2, rtol=3e-2), float(blk_err)

    # --- full VGGNet forward ---
    out = jax.block_until_ready(vgg_forward(x, params, NET))
    ref = _ref_vgg_forward(x, params, net_type=NET)
    assert out.shape == (BATCH, FC_OUT), out.shape
    assert jnp.allclose(out, ref, atol=3e-2, rtol=3e-2), \
        float(jnp.max(jnp.abs(out - ref)))

    print("KERNEL_OK")
</pallas_src>

<mosaic_0001>
module attributes {stable_mosaic.version = 11 : i64} {
  func.func @_bn_relu_kernel(%arg0: i32, %arg1: memref<512x128xf32, #tpu.memory_space<vmem>>, %arg2: memref<1x128xf32, #tpu.memory_space<vmem>>, %arg3: memref<1x128xf32, #tpu.memory_space<vmem>>, %arg4: memref<512x128xbf16, #tpu.memory_space<vmem>>) attributes {dimension_semantics = [#tpu.dimension_semantics<parallel>], iteration_bounds = array<i64: 4>, scalar_prefetch = 0 : i64, scratch_operands = 0 : i64, tpu.core_type = #tpu.core_type<tc>, window_params = [{transform_indices = @transform_0, window_bounds = array<i64: 512, 128>}, {pipeline_mode = #tpu.pipeline_mode<synchronous>, transform_indices = @transform_1, window_bounds = array<i64: 1, 128>}, {pipeline_mode = #tpu.pipeline_mode<synchronous>, transform_indices = @transform_2, window_bounds = array<i64: 1, 128>}, {transform_indices = @transform_3, window_bounds = array<i64: 512, 128>}]} {
    %c0 = arith.constant 0 : index
    %c0_0 = arith.constant 0 : index
    %0 = vector.load %arg1[%c0, %c0_0] : memref<512x128xf32, #tpu.memory_space<vmem>>, vector<512x128xf32>
    %c0_1 = arith.constant 0 : index
    %c0_2 = arith.constant 0 : index
    %1 = vector.load %arg2[%c0_1, %c0_2] : memref<1x128xf32, #tpu.memory_space<vmem>>, vector<1x128xf32>
    %2 = vector.broadcast %1 : vector<1x128xf32> to vector<512x128xf32>
    %3 = arith.mulf %0, %2 : vector<512x128xf32>
    %c0_3 = arith.constant 0 : index
    %c0_4 = arith.constant 0 : index
    %4 = vector.load %arg3[%c0_3, %c0_4] : memref<1x128xf32, #tpu.memory_space<vmem>>, vector<1x128xf32>
    %5 = vector.broadcast %4 : vector<1x128xf32> to vector<512x128xf32>
    %6 = arith.addf %3, %5 : vector<512x128xf32>
    %cst = arith.constant 0.000000e+00 : f32
    %7 = vector.broadcast %cst : f32 to vector<512x128xf32>
    %8 = arith.maximumf %6, %7 : vector<512x128xf32>
    %9 = arith.truncf %8 : vector<512x128xf32> to vector<512x128xbf16>
    %c0_5 = arith.constant 0 : index
    %c0_6 = arith.constant 0 : index
    %10 = vector.load %arg4[%c0_5, %c0_6] : memref<512x128xbf16, #tpu.memory_space<vmem>>, vector<512x128xbf16>
    tpu.vector_store %arg4[%c0_5, %c0_6], %9 {strides = array<i32>} : memref<512x128xbf16, #tpu.memory_space<vmem>>, vector<512x128xbf16>,
    return
  }
  func.func @transform_0(%arg0: i32) -> (i32, i32) {
    %c0_i32 = arith.constant 0 : i32
    %c0_i32_0 = arith.constant 0 : i32
    return %arg0, %c0_i32 : i32, i32
  }
  func.func @transform_1(%arg0: i32) -> (i32, i32) {
    %c0_i32 = arith.constant 0 : i32
    %c0_i32_0 = arith.constant 0 : i32
    %c0_i32_1 = arith.constant 0 : i32
    return %c0_i32, %c0_i32_0 : i32, i32
  }
  func.func @transform_2(%arg0: i32) -> (i32, i32) {
    %c0_i32 = arith.constant 0 : i32
    %c0_i32_0 = arith.constant 0 : i32
    %c0_i32_1 = arith.constant 0 : i32
    return %c0_i32, %c0_i32_0 : i32, i32
  }
  func.func @transform_3(%arg0: i32) -> (i32, i32) {
    %c0_i32 = arith.constant 0 : i32
    %c0_i32_0 = arith.constant 0 : i32
    return %arg0, %c0_i32 : i32, i32
  }
}

module attributes {stable_mosaic.version = 11 : i64} {
  func.func @_conv_stats_kernel(%arg0: i32, %arg1: i32, %arg2: memref<1x1x34x3xbf16, #tpu.memory_space<vmem>>, %arg3: memref<1x1x34x3xbf16, #tpu.memory_space<vmem>>, %arg4: memref<1x1x34x3xbf16, #tpu.memory_space<vmem>>, %arg5: memref<3x3x3x128xbf16, #tpu.memory_space<vmem>>, %arg6: memref<1x1x32x128xf32, #tpu.memory_space<vmem>>, %arg7: memref<1x128xf32, #tpu.memory_space<vmem>>, %arg8: memref<1x128xf32, #tpu.memory_space<vmem>>) attributes {dimension_semantics = [#tpu.dimension_semantics<arbitrary>, #tpu.dimension_semantics<arbitrary>], iteration_bounds = array<i64: 2, 32>, scalar_prefetch = 0 : i64, scratch_operands = 0 : i64, tpu.core_type = #tpu.core_type<tc>, window_params = [{transform_indices = @transform_0, window_bounds = array<i64: 1, 1, 34, 3>}, {transform_indices = @transform_1, window_bounds = array<i64: 1, 1, 34, 3>}, {transform_indices = @transform_2, window_bounds = array<i64: 1, 1, 34, 3>}, {pipeline_mode = #tpu.pipeline_mode<synchronous>, transform_indices = @transform_3, window_bounds = array<i64: 3, 3, 3, 128>}, {transform_indices = @transform_4, window_bounds = array<i64: 1, 1, 32, 128>}, {pipeline_mode = #tpu.pipeline_mode<synchronous>, transform_indices = @transform_5, window_bounds = array<i64: 1, 128>}, {pipeline_mode = #tpu.pipeline_mode<synchronous>, transform_indices = @transform_6, window_bounds = array<i64: 1, 128>}]} {
    %c0_i32 = arith.constant 0 : i32
    %0 = arith.cmpi eq, %arg0, %c0_i32 : i32
    %c0_i32_0 = arith.constant 0 : i32
    %1 = arith.cmpi eq, %arg1, %c0_i32_0 : i32
    %2 = arith.andi %0, %1 : i1
    %3 = arith.extui %2 : i1 to i32
    %c0_i32_1 = arith.constant 0 : i32
    %4 = arith.cmpi ne, %3, %c0_i32_1 : i32
    scf.if %4 {
      %cst_70 = arith.constant 0.000000e+00 : f32
      %71 = vector.broadcast %cst_70 : f32 to vector<1x128xf32>
      %c0_71 = arith.constant 0 : index
      %c0_72 = arith.constant 0 : index
      %72 = vector.load %arg7[%c0_71, %c0_72] : memref<1x128xf32, #tpu.memory_space<vmem>>, vector<1x128xf32>
      tpu.vector_store %arg7[%c0_71, %c0_72], %71 {strides = array<i32>} : memref<1x128xf32, #tpu.memory_space<vmem>>, vector<1x128xf32>,
      %cst_73 = arith.constant 0.000000e+00 : f32
      %73 = vector.broadcast %cst_73 : f32 to vector<1x128xf32>
      %c0_74 = arith.constant 0 : index
      %c0_75 = arith.constant 0 : index
      %74 = vector.load %arg8[%c0_74, %c0_75] : memref<1x128xf32, #tpu.memory_space<vmem>>, vector<1x128xf32>
      tpu.vector_store %arg8[%c0_74, %c0_75], %73 {strides = array<i32>} : memref<1x128xf32, #tpu.memory_space<vmem>>, vector<1x128xf32>,
    } else {
    }
    %cst = arith.constant 0.000000e+00 : f32
    %5 = vector.broadcast %cst : f32 to vector<32x128xf32>
    %c0 = arith.constant 0 : index
    %c0_2 = arith.constant 0 : index
    %c0_3 = arith.constant 0 : index
    %c0_4 = arith.constant 0 : index
    %6 = vector.load %arg2[%c0, %c0_2, %c0_3, %c0_4] : memref<1x1x34x3xbf16, #tpu.memory_space<vmem>>, vector<1x1x34x3xbf16>
    %7 = vector.shape_cast %6 : vector<1x1x34x3xbf16> to vector<34x3xbf16>
    %8 = vector.extract_strided_slice %7 {offsets = [0, 0], sizes = [32, 3], strides = [1, 1]} : vector<34x3xbf16> to vector<32x3xbf16>
    %c0_5 = arith.constant 0 : index
    %c0_6 = arith.constant 0 : index
    %c0_7 = arith.constant 0 : index
    %c0_8 = arith.constant 0 : index
    %9 = vector.load %arg5[%c0_5, %c0_6, %c0_7, %c0_8] : memref<3x3x3x128xbf16, #tpu.memory_space<vmem>>, vector<1x1x3x128xbf16>
    %10 = vector.shape_cast %9 : vector<1x1x3x128xbf16> to vector<3x128xbf16>
    %cst_9 = arith.constant dense<0.000000e+00> : vector<32x128xf32>
    %11 = tpu.matmul %8, %10, %cst_9 {dimension_numbers = #tpu.dot_dimension_numbers<[1], [0], [0], [1], [0, 0, 1, 1], [], []>} : vector<32x3xbf16>, vector<3x128xbf16>, vector<32x128xf32> -> vector<32x128xf32>
    %12 = arith.addf %5, %11 : vector<32x128xf32>
    %13 = vector.extract_strided_slice %7 {offsets = [1, 0], sizes = [32, 3], strides = [1, 1]} : vector<34x3xbf16> to vector<32x3xbf16>
    %c0_10 = arith.constant 0 : index
    %c1 = arith.constant 1 : index
    %c0_11 = arith.constant 0 : index
    %c0_12 = arith.constant 0 : index
    %14 = vector.load %arg5[%c0_10, %c1, %c0_11, %c0_12] : memref<3x3x3x128xbf16, #tpu.memory_space<vmem>>, vector<1x1x3x128xbf16>
    %15 = vector.shape_cast %14 : vector<1x1x3x128xbf16> to vector<3x128xbf16>
    %cst_13 = arith.constant dense<0.000000e+00> : vector<32x128xf32>
    %16 = tpu.matmul %13, %15, %cst_13 {dimension_numbers = #tpu.dot_dimension_numbers<[1], [0], [0], [1], [0, 0, 1, 1], [], []>} : vector<32x3xbf16>, vector<3x128xbf16>, vector<32x128xf32> -> vector<32x128xf32>
    %17 = arith.addf %12, %16 : vector<32x128xf32>
    %18 = vector.extract_strided_slice %7 {offsets = [2, 0], sizes = [32, 3], strides = [1, 1]} : vector<34x3xbf16> to vector<32x3xbf16>
    %c0_14 = arith.constant 0 : index
    %c2 = arith.constant 2 : index
    %c0_15 = arith.constant 0 : index
    %c0_16 = arith.constant 0 : index
    %19 = vector.load %arg5[%c0_14, %c2, %c0_15, %c0_16] : memref<3x3x3x128xbf16, #tpu.memory_space<vmem>>, vector<1x1x3x128xbf16>
    %20 = vector.shape_cast %19 : vector<1x1x3x128xbf16> to vector<3x128xbf16>
    %cst_17 = arith.constant dense<0.000000e+00> : vector<32x128xf32>
    %21 = tpu.matmul %18, %20, %cst_17 {dimension_numbers = #tpu.dot_dimension_numbers<[1], [0], [0], [1], [0, 0, 1, 1], [], []>} : vector<32x3xbf16>, vector<3x128xbf16>, vector<32x128xf32> -> vector<32x128xf32>
    %22 = arith.addf %17, %21 : vector<32x128xf32>
    %c0_18 = arith.constant 0 : index
    %c0_19 = arith.constant 0 : index
    %c0_20 = arith.constant 0 : index
    %c0_21 = arith.constant 0 : index
    %23 = vector.load %arg3[%c0_18, %c0_19, %c0_20, %c0_21] : memref<1x1x34x3xbf16, #tpu.memory_space<vmem>>, vector<1x1x34x3xbf16>
    %24 = vector.shape_cast %23 : vector<1x1x34x3xbf16> to vector<34x3xbf16>
    %25 = vector.extract_strided_slice %24 {offsets = [0, 0], sizes = [32, 3], strides = [1, 1]} : vector<34x3xbf16> to vector<32x3xbf16>
    %c1_22 = arith.constant 1 : index
    %c0_23 = arith.constant 0 : index
    %c0_24 = arith.constant 0 : index
    %c0_25 = arith.constant 0 : index
    %26 = vector.load %arg5[%c1_22, %c0_23, %c0_24, %c0_25] : memref<3x3x3x128xbf16, #tpu.memory_space<vmem>>, vector<1x1x3x128xbf16>
    %27 = vector.shape_cast %26 : vector<1x1x3x128xbf16> to vector<3x128xbf16>
    %cst_26 = arith.constant dense<0.000000e+00> : vector<32x128xf32>
    %28 = tpu.matmul %25, %27, %cst_26 {dimension_numbers = #tpu.dot_dimension_numbers<[1], [0], [0], [1], [0, 0, 1, 1], [], []>} : vector<32x3xbf16>, vector<3x128xbf16>, vector<32x128xf32> -> vector<32x128xf32>
    %29 = arith.addf %22, %28 : vector<32x128xf32>
    %30 = vector.extract_strided_slice %24 {offsets = [1, 0], sizes = [32, 3], strides = [1, 1]} : vector<34x3xbf16> to vector<32x3xbf16>
    %c1_27 = arith.constant 1 : index
    %c1_28 = arith.constant 1 : index
    %c0_29 = arith.constant 0 : index
    %c0_30 = arith.constant 0 : index
    %31 = vector.load %arg5[%c1_27, %c1_28, %c0_29, %c0_30] : memref<3x3x3x128xbf16, #tpu.memory_space<vmem>>, vector<1x1x3x128xbf16>
    %32 = vector.shape_cast %31 : vector<1x1x3x128xbf16> to vector<3x128xbf16>
    %cst_31 = arith.constant dense<0.000000e+00> : vector<32x128xf32>
    %33 = tpu.matmul %30, %32, %cst_31 {dimension_numbers = #tpu.dot_dimension_numbers<[1], [0], [0], [1], [0, 0, 1, 1], [], []>} : vector<32x3xbf16>, vector<3x128xbf16>, vector<32x128xf32> -> vector<32x128xf32>
    %34 = arith.addf %29, %33 : vector<32x128xf32>
    %35 = vector.extract_strided_slice %24 {offsets = [2, 0], sizes = [32, 3], strides = [1, 1]} : vector<34x3xbf16> to vector<32x3xbf16>
    %c1_32 = arith.constant 1 : index
    %c2_33 = arith.constant 2 : index
    %c0_34 = arith.constant 0 : index
    %c0_35 = arith.constant 0 : index
    %36 = vector.load %arg5[%c1_32, %c2_33, %c0_34, %c0_35] : memref<3x3x3x128xbf16, #tpu.memory_space<vmem>>, vector<1x1x3x128xbf16>
    %37 = vector.shape_cast %36 : vector<1x1x3x128xbf16> to vector<3x128xbf16>
    %cst_36 = arith.constant dense<0.000000e+00> : vector<32x128xf32>
    %38 = tpu.matmul %35, %37, %cst_36 {dimension_numbers = #tpu.dot_dimension_numbers<[1], [0], [0], [1], [0, 0, 1, 1], [], []>} : vector<32x3xbf16>, vector<3x128xbf16>, vector<32x128xf32> -> vector<32x128xf32>
    %39 = arith.addf %34, %38 : vector<32x128xf32>
    %c0_37 = arith.constant 0 : index
    %c0_38 = arith.constant 0 : index
    %c0_39 = arith.constant 0 : index
    %c0_40 = arith.constant 0 : index
    %40 = vector.load %arg4[%c0_37, %c0_38, %c0_39, %c0_40] : memref<1x1x34x3xbf16, #tpu.memory_space<vmem>>, vector<1x1x34x3xbf16>
    %41 = vector.shape_cast %40 : vector<1x1x34x3xbf16> to vector<34x3xbf16>
    %42 = vector.extract_strided_slice %41 {offsets = [0, 0], sizes = [32, 3], strides = [1, 1]} : vector<34x3xbf16> to vector<32x3xbf16>
    %c2_41 = arith.constant 2 : index
    %c0_42 = arith.constant 0 : index
    %c0_43 = arith.constant 0 : index
    %c0_44 = arith.constant 0 : index
    %43 = vector.load %arg5[%c2_41, %c0_42, %c0_43, %c0_44] : memref<3x3x3x128xbf16, #tpu.memory_space<vmem>>, vector<1x1x3x128xbf16>
    %44 = vector.shape_cast %43 : vector<1x1x3x128xbf16> to vector<3x128xbf16>
    %cst_45 = arith.constant dense<0.000000e+00> : vector<32x128xf32>
    %45 = tpu.matmul %42, %44, %cst_45 {dimension_numbers = #tpu.dot_dimension_numbers<[1], [0], [0], [1], [0, 0, 1, 1], [], []>} : vector<32x3xbf16>, vector<3x128xbf16>, vector<32x128xf32> -> vector<32x128xf32>
    %46 = arith.addf %39, %45 : vector<32x128xf32>
    %47 = vector.extract_strided_slice %41 {offsets = [1, 0], sizes = [32, 3], strides = [1, 1]} : vector<34x3xbf16> to vector<32x3xbf16>
    %c2_46 = arith.constant 2 : index
    %c1_47 = arith.constant 1 : index
    %c0_48 = arith.constant 0 : index
    %c0_49 = arith.constant 0 : index
    %48 = vector.load %arg5[%c2_46, %c1_47, %c0_48, %c0_49] : memref<3x3x3x128xbf16, #tpu.memory_space<vmem>>, vector<1x1x3x128xbf16>
    %49 = vector.shape_cast %48 : vector<1x1x3x128xbf16> to vector<3x128xbf16>
    %cst_50 = arith.constant dense<0.000000e+00> : vector<32x128xf32>
    %50 = tpu.matmul %47, %49, %cst_50 {dimension_numbers = #tpu.dot_dimension_numbers<[1], [0], [0], [1], [0, 0, 1, 1], [], []>} : vector<32x3xbf16>, vector<3x128xbf16>, vector<32x128xf32> -> vector<32x128xf32>
    %51 = arith.addf %46, %50 : vector<32x128xf32>
    %52 = vector.extract_strided_slice %41 {offsets = [2, 0], sizes = [32, 3], strides = [1, 1]} : vector<34x3xbf16> to vector<32x3xbf16>
    %c2_51 = arith.constant 2 : index
    %c2_52 = arith.constant 2 : index
    %c0_53 = arith.constant 0 : index
    %c0_54 = arith.constant 0 : index
    %53 = vector.load %arg5[%c2_51, %c2_52, %c0_53, %c0_54] : memref<3x3x3x128xbf16, #tpu.memory_space<vmem>>, vector<1x1x3x128xbf16>
    %54 = vector.shape_cast %53 : vector<1x1x3x128xbf16> to vector<3x128xbf16>
    %cst_55 = arith.constant dense<0.000000e+00> : vector<32x128xf32>
    %55 = tpu.matmul %52, %54, %cst_55 {dimension_numbers = #tpu.dot_dimension_numbers<[1], [0], [0], [1], [0, 0, 1, 1], [], []>} : vector<32x3xbf16>, vector<3x128xbf16>, vector<32x128xf32> -> vector<32x128xf32>
    %56 = arith.addf %51, %55 : vector<32x128xf32>
    %c0_56 = arith.constant 0 : index
    %c0_57 = arith.constant 0 : index
    %c0_58 = arith.constant 0 : index
    %c0_59 = arith.constant 0 : index
    %57 = vector.load %arg6[%c0_56, %c0_57, %c0_58, %c0_59] : memref<1x1x32x128xf32, #tpu.memory_space<vmem>>, vector<1x1x32x128xf32>
    %58 = vector.shape_cast %57 : vector<1x1x32x128xf32> to vector<32x128xf32>
    %59 = vector.shape_cast %56 : vector<32x128xf32> to vector<1x1x32x128xf32>
    tpu.vector_store %arg6[%c0_56, %c0_57, %c0_58, %c0_59], %59 {strides = array<i32>} : memref<1x1x32x128xf32, #tpu.memory_space<vmem>>, vector<1x1x32x128xf32>,
    %c0_60 = arith.constant 0 : index
    %c0_61 = arith.constant 0 : index
    %60 = vector.load %arg7[%c0_60, %c0_61] : memref<1x128xf32, #tpu.memory_space<vmem>>, vector<1x128xf32>
    %cst_62 = arith.constant dense<0.000000e+00> : vector<128xf32>
    %61 = vector.multi_reduction <add>, %56, %cst_62 [0] : vector<32x128xf32> to vector<128xf32>
    %62 = vector.shape_cast %61 : vector<128xf32> to vector<1x128xf32>
    %63 = arith.addf %60, %62 : vector<1x128xf32>
    %c0_63 = arith.constant 0 : index
    %c0_64 = arith.constant 0 : index
    %64 = vector.load %arg7[%c0_63, %c0_64] : memref<1x128xf32, #tpu.memory_space<vmem>>, vector<1x128xf32>
    tpu.vector_store %arg7[%c0_63, %c0_64], %63 {strides = array<i32>} : memref<1x128xf32, #tpu.memory_space<vmem>>, vector<1x128xf32>,
    %c0_65 = arith.constant 0 : index
    %c0_66 = arith.constant 0 : index
    %65 = vector.load %arg8[%c0_65, %c0_66] : memref<1x128xf32, #tpu.memory_space<vmem>>, vector<1x128xf32>
    %66 = arith.mulf %56, %56 : vector<32x128xf32>
    %cst_67 = arith.constant dense<0.000000e+00> : vector<128xf32>
    %67 = vector.multi_reduction <add>, %66, %cst_67 [0] : vector<32x128xf32> to vector<128xf32>
    %68 = vector.shape_cast %67 : vector<128xf32> to vector<1x128xf32>
    %69 = arith.addf %65, %68 : vector<1x128xf32>
    %c0_68 = arith.constant 0 : index
    %c0_69 = arith.constant 0 : index
    %70 = vector.load %arg8[%c0_68, %c0_69] : memref<1x128xf32, #tpu.memory_space<vmem>>, vector<1x128xf32>
    tpu.vector_store %arg8[%c0_68, %c0_69], %69 {strides = array<i32>} : memref<1x128xf32, #tpu.memory_space<vmem>>, vector<1x128xf32>,
    return
  }
  func.func @transform_0(%arg0: i32, %arg1: i32) -> (i32, i32, i32, i32) {
    %c0_i32 = arith.constant 0 : i32
    %0 = arith.addi %arg1, %c0_i32 : i32
    %c0_i32_0 = arith.constant 0 : i32
    %c0_i32_1 = arith.constant 0 : i32
    %c0_i32_2 = arith.constant 0 : i32
    return %arg0, %0, %c0_i32_0, %c0_i32_1 : i32, i32, i32, i32
  }
  func.func @transform_1(%arg0: i32, %arg1: i32) -> (i32, i32, i32, i32) {
    %c1_i32 = arith.constant 1 : i32
    %0 = arith.addi %arg1, %c1_i32 : i32
    %c0_i32 = arith.constant 0 : i32
    %c0_i32_0 = arith.constant 0 : i32
    %c0_i32_1 = arith.constant 0 : i32
    return %arg0, %0, %c0_i32, %c0_i32_0 : i32, i32, i32, i32
  }
  func.func @transform_2(%arg0: i32, %arg1: i32) -> (i32, i32, i32, i32) {
    %c2_i32 = arith.constant 2 : i32
    %0 = arith.addi %arg1, %c2_i32 : i32
    %c0_i32 = arith.constant 0 : i32
    %c0_i32_0 = arith.constant 0 : i32
    %c0_i32_1 = arith.constant 0 : i32
    return %arg0, %0, %c0_i32, %c0_i32_0 : i32, i32, i32, i32
  }
  func.func @transform_3(%arg0: i32, %arg1: i32) -> (i32, i32, i32, i32) {
    %c0_i32 = arith.constant 0 : i32
    %c0_i32_0 = arith.constant 0 : i32
    %c0_i32_1 = arith.constant 0 : i32
    %c0_i32_2 = arith.constant 0 : i32
    %c0_i32_3 = arith.constant 0 : i32
    return %c0_i32, %c0_i32_0, %c0_i32_1, %c0_i32_2 : i32, i32, i32, i32
  }
  func.func @transform_4(%arg0: i32, %arg1: i32) -> (i32, i32, i32, i32) {
    %c0_i32 = arith.constant 0 : i32
    %c0_i32_0 = arith.constant 0 : i32
    %c0_i32_1 = arith.constant 0 : i32
    return %arg0, %arg1, %c0_i32, %c0_i32_0 : i32, i32, i32, i32
  }
  func.func @transform_5(%arg0: i32, %arg1: i32) -> (i32, i32) {
    %c0_i32 = arith.constant 0 : i32
    %c0_i32_0 = arith.constant 0 : i32
    %c0_i32_1 = arith.constant 0 : i32
    return %c0_i32, %c0_i32_0 : i32, i32
  }
  func.func @transform_6(%arg0: i32, %arg1: i32) -> (i32, i32) {
    %c0_i32 = arith.constant 0 : i32
    %c0_i32_0 = arith.constant 0 : i32
    %c0_i32_1 = arith.constant 0 : i32
    return %c0_i32, %c0_i32_0 : i32, i32
  }
}

</mosaic_0001>

<bundles_post_ra>
// kernel: convblock_forward.3
= control target key start
LH: loop header
LB: loop body
LE: loop exit
PB: predicated region body
PF: predicated region fallthrough
CT: control target
= control target key end

     0   :  { %8 = vsyncpa [#allocation3], 0  ;;  %s1645_s0 = inlined_call_operand.vmem [shape: f32[2048,128], index: 0, kind: input, shape index: {}]   ;;  %s1646_s1 = inlined_call_operand.vmem [shape: f32[1,128], index: 1, kind: input, shape index: {}]   ;;  %s1647_s2 = inlined_call_operand.vmem [shape: f32[1,128], index: 2, kind: input, shape index: {}]   ;;  %s1648_s3 = inlined_call_operand.hbm [shape: bf16[2048,128], index: 3, kind: output, shape index: {}]  }
   0x1   :  { %10 = vsyncpa [#allocation3 + $0x1], 0  ;;  %s1298_s12 = smov 0   ;;  %s1300_s13 = smov 0  }
   0x2   :  { %s1302_s14 = smov 0   ;;  %s1304_s15 = smov 0  }
   0x3 LB: > { %s1319_s16 = sadd.s32 4294967295, %s1273_s15   ;;  %s838_s17 = sadd.s32 4294967294, %s1273_s15   ;;  %s1273_s15 = sphi %s1304_s15, %s1654_s15   ;;  %s1269_s14 = sphi %s1302_s14, %s1653_s14   ;;  %s1265_s13 = sphi %s1300_s13, %s1652_s13   ;;  %s1261_s12 = sphi %s1298_s12, %s1651_s12  }
   0x4   : > { %s1323_s18 = sadd.s32 1, %s1273_s15   ;;  %s91_s19 = sadd.s32 1, %s1269_s14 }
   0x5   : > { %s88_s20 = ssub.s32 %s1273_s15, %s1323_s18  ;;  %p101_p0 = scmp.ne.s32.totalorder %s1269_s14, %s1265_s13 }
   0x6   : > { %p89_p1 = scmp.eq.s32.totalorder %s88_s20, 0  ;;  %p102_p2 = scmp.eq.s32.totalorder %s1319_s16, 3 }
   0x7   : > { %p107_p3 = scmp.ne.s32.totalorder %s1265_s13, %s1261_s12  ;;  %p108_p4 = scmp.eq.s32.totalorder %s838_s17, 3 }
   0x8   : > { %s1334_s21 = scalar_select %p89_p1, %s1269_s14, %s91_s19  }
   0x9   : > { %p1336_p5 = por %p102_p2, %p101_p0  ;;  %p1340_p6 = por %p108_p4, %p107_p3 }
   0xa   : > { %p841_p7 = scmp.ge.s32.totalorder %s1273_s15, 1  ;;  %p141_p8 = scmp.lt.s32.totalorder %s1273_s15, 5 }
   0xc   : > { %p142_p9 = pnand %p841_p7, %p141_p8 }
   0xd   : > { %s843_s24 = sshll.u32 (!%p142_p9), %s1319_s16, 6  ;;  %s162_s6 = sand.u32 (!%p142_p9), 1, %s1265_s13  }
   0xe   : > { %145 = sbr.rel (%p142_p9) target bundleno = 98 (0x62), region = 32  ;;  %p166_p10 = scmp.lt.s32.totalorder (!%p142_p9), %s843_s24, 255 }
   0xf   : > { %s1379_s7 = sshll.u32 (!%p142_p9), %s162_s6, 8  ;;  %s980_s9 = sshll.u32 (!%p142_p9), %s1319_s16, 12 }
  0x10   : > { %s1402_s8 = scalar_lea.vmem (!%p142_p9), [#allocation2], %s1379_s7  ;;  %s1597_s19 = scalar_lea.hbm (!%p142_p9), %s1648_s3, %s980_s9 }
  0x11   : > { %s776_s10 = sshll.u32 (!%p142_p9), %s1402_s8, 4  ;;  %s1605_s16 = scalar_lea.sflag (!%p142_p9), [#allocation3], %s162_s6  ;;  %s1599_s10 = int_to_ptr.vmem [resolvable:$true] %s776_s10 }
  0x12   : > { %s1213_s20 = scalar_lea.vmem (!%p142_p9), %s1599_s10, 4096 }
  0x13   : > { %s1656_s24 = smov (!%p166_p10, %s843_s24), 255  ;;  %v1350_v0 = vld [vmem:[%s1646_s1] ss:$0 sm:$0xff]  ;;  %p1214_p11 = scmp.ne.s32.totalorder %s1599_s10, %s1213_s20 }
  0x14   : > { %s844_s25 = sshll.u32 %s1656_s24, 3  ;;  %v1360_v1 = vld [vmem:[%s1647_s2] ss:$0 sm:$0xff]  ;;  %s1275_s24 = smov [#allocation2]  }
  0x15   : > { %s1355_s30 = scalar_lea.vmem %s1645_s0, %s844_s25  ;;  %p1215_p12 = pnand %p1214_p11, %p1336_p5 }
  0x16   : > { %v172_v2 = vld [vmem:[%s1355_s30] sm:$0xff]  ;;  %v173_v3 = vld [vmem:[%s1355_s30 + $0x8] sm:$0xff]  ;;  %v174_v4 = vld [vmem:[%s1355_s30 + $0x10] sm:$0xff]  ;;  %s1217_s25 = sshll.u32 %s1275_s24, 4  ;;  %s1218_s25 = int_to_ptr.vmem [resolvable:$false] %s1217_s25 }
  0x17   : > { %v243_v5 = vmul.f32 %v1350_v0, %v172_v2  ;;  %v244_v6 = vmul.f32 %v1350_v0, %v173_v3  ;;  %v175_v7 = vld [vmem:[%s1355_s30 + $0x18] sm:$0xff]  ;;  %v245_v8 = vmul.f32 %v1350_v0, %v174_v4  ;;  %v176_v9 = vld [vmem:[%s1355_s30 + $0x20] sm:$0xff]  ;;  %v177_v10 = vld [vmem:[%s1355_s30 + $0x28] sm:$0xff]  ;;  %p1216_p13 = pneg %p1215_p12  ;;  %s1219_s26 = scalar_lea.vmem %s1218_s25, 8192 }
  0x18   : > { %v246_v11 = vmul.f32 %v1350_v0, %v175_v7  ;;  %v247_v12 = vmul.f32 %v1350_v0, %v176_v9  ;;  %v248_v13 = vmul.f32 %v1350_v0, %v177_v10  ;;  %v178_v14 = vld [vmem:[%s1355_s30 + $0x30] sm:$0xff]  ;;  %v179_v15 = vld [vmem:[%s1355_s30 + $0x38] sm:$0xff]  ;;  %v180_v24 = vld [vmem:[%s1355_s30 + $0x40] sm:$0xff]  ;;  %p1220_p0 = scmp.lt.s32.totalorder %s1599_s10, %s1218_s25  ;;  %p1221_p1 = scmp.lt.s32.totalorder %s1219_s26, %s1213_s20 }
  0x19   : > { %v314_v16 = vadd.f32 %v1360_v1, %v243_v5  ;;  %v315_v17 = vadd.f32 %v1360_v1, %v244_v6  ;;  %v316_v18 = vadd.f32 %v1360_v1, %v245_v8  ;;  %v249_v19 = vmul.f32 %v1350_v0, %v178_v14  ;;  %v181_v25 = vld [vmem:[%s1355_s30 + $0x48] sm:$0xff]  ;;  %v182_v30 = vld [vmem:[%s1355_s30 + $0x50] sm:$0xff]  ;;  %v183_v35 = vld [vmem:[%s1355_s30 + $0x58] sm:$0xff] }
  0x1a   : > { %v317_v20 = vadd.f32 %v1360_v1, %v246_v11  ;;  %v318_v21 = vadd.f32 %v1360_v1, %v247_v12  ;;  %v319_v22 = vadd.f32 %v1360_v1, %v248_v13  ;;  %v250_v23 = vmul.f32 %v1350_v0, %v179_v15  ;;  %v184_v36 = vld [vmem:[%s1355_s30 + $0x60] sm:$0xff]  ;;  %v185_v41 = vld [vmem:[%s1355_s30 + $0x68] sm:$0xff]  ;;  %v186_v42 = vld [vmem:[%s1355_s30 + $0x70] sm:$0xff]  ;;  %p1222_p2 = por %p1221_p1, %p1220_p0 }
  0x1b   : > { %v378_v26 = vmax.f32 %v314_v16, 0.0  ;;  %v379_v27 = vmax.f32 %v315_v17, 0.0  ;;  %v380_v28 = vmax.f32 %v316_v18, 0.0  ;;  %v320_v29 = vadd.f32 %v1360_v1, %v249_v19  ;;  %v187_v51 = vld [vmem:[%s1355_s30 + $0x78] sm:$0xff]  ;;  %v188_v56 = vld [vmem:[%s1355_s30 + $0x80] sm:$0xff]  ;;  %v189_v61 = vld [vmem:[%s1355_s30 + $0x88] sm:$0xff] }
  0x1c   : > { %v381_v31 = vmax.f32 %v317_v20, 0.0  ;;  %v382_v32 = vmax.f32 %v318_v21, 0.0  ;;  %v383_v33 = vmax.f32 %v319_v22, 0.0  ;;  %v321_v34 = vadd.f32 %v1360_v1, %v250_v23  ;;  %v190_v4 = vld [vmem:[%s1355_s30 + $0x90] sm:$0xff]  ;;  %v191_v5 = vld [vmem:[%s1355_s30 + $0x98] sm:$0xff]  ;;  %v192_v10 = vld [vmem:[%s1355_s30 + $0xa0] sm:$0xff]  ;;  %p1223_p3 = pnand %p1222_p2, %p1216_p13 }
  0x1d   : > { %v984_v37 = vpack.c.bf16 %v379_v27, %v378_v26  ;;  %v384_v38 = vmax.f32 %v320_v29, 0.0  ;;  %v251_v39 = vmul.f32 %v1350_v0, %v180_v24  ;;  %v252_v40 = vmul.f32 %v1350_v0, %v181_v25  ;;  %v193_v15 = vld [vmem:[%s1355_s30 + $0xa8] sm:$0xff]  ;;  %v194_v20 = vld [vmem:[%s1355_s30 + $0xb0] sm:$0xff]  ;;  %v195_v25 = vld [vmem:[%s1355_s30 + $0xb8] sm:$0xff] }
  0x1e   : > { %v989_v43 = vpack.c.bf16 %v381_v31, %v380_v28  ;;  %v994_v44 = vpack.c.bf16 %v383_v33, %v382_v32  ;;  %v385_v45 = vmax.f32 %v321_v34, 0.0  ;;  %v253_v46 = vmul.f32 %v1350_v0, %v182_v30  ;;  %v196_v30 = vld [vmem:[%s1355_s30 + $0xc0] sm:$0xff] }
  0x1f   : > { %985 = vst [vmem:[%s1402_s8] sm:$0xff] %v984_v37   ;;  %v322_v47 = vadd.f32 %v1360_v1, %v251_v39  ;;  %v323_v48 = vadd.f32 %v1360_v1, %v252_v40  ;;  %v254_v49 = vmul.f32 %v1350_v0, %v183_v35  ;;  %v255_v50 = vmul.f32 %v1350_v0, %v184_v36  ;;  %v197_v35 = vld [vmem:[%s1355_s30 + $0xc8] sm:$0xff]  ;;  %v198_v40 = vld [vmem:[%s1355_s30 + $0xd0] sm:$0xff] }
  0x20   : > { %1141 = vst [vmem:[%s1402_s8 + $0x8] sm:$0xff] %v989_v43   ;;  %1142 = vst [vmem:[%s1402_s8 + $0x10] sm:$0xff] %v994_v44   ;;  %v999_v52 = vpack.c.bf16 %v385_v45, %v384_v38  ;;  %v324_v53 = vadd.f32 %v1360_v1, %v253_v46  ;;  %v256_v54 = vmul.f32 %v1350_v0, %v185_v41  ;;  %v199_v41 = vld [vmem:[%s1355_s30 + $0xd8] sm:$0xff]  ;;  %v200_v46 = vld [vmem:[%s1355_s30 + $0xe0] sm:$0xff] }
  0x21   : > { %v257_v55 = vmul.f32 %v1350_v0, %v186_v42  ;;  %v386_v57 = vmax.f32 %v322_v47, 0.0  ;;  %v387_v58 = vmax.f32 %v323_v48, 0.0  ;;  %v325_v59 = vadd.f32 %v1360_v1, %v254_v49 }
  0x22   : > { %v326_v60 = vadd.f32 %v1360_v1, %v255_v50  ;;  %1143 = vst [vmem:[%s1402_s8 + $0x18] sm:$0xff] %v999_v52   ;;  %v388_v62 = vmax.f32 %v324_v53, 0.0  ;;  %v327_v63 = vadd.f32 %v1360_v1, %v256_v54  ;;  %v258_v2 = vmul.f32 %v1350_v0, %v187_v51  ;;  %v201_v51 = vld [vmem:[%s1355_s30 + $0xe8] sm:$0xff] }
  0x23   : > { %v328_v3 = vadd.f32 %v1360_v1, %v257_v55  ;;  %v1004_v6 = vpack.c.bf16 %v387_v58, %v386_v57  ;;  %v389_v7 = vmax.f32 %v325_v59, 0.0  ;;  %v259_v9 = vmul.f32 %v1350_v0, %v188_v56  ;;  %v202_v56 = vld [vmem:[%s1355_s30 + $0xf0] sm:$0xff] }
  0x24   : > { %v390_v8 = vmax.f32 %v326_v60, 0.0  ;;  %v391_v11 = vmax.f32 %v327_v63, 0.0  ;;  %v329_v12 = vadd.f32 %v1360_v1, %v258_v2  ;;  %v260_v14 = vmul.f32 %v1350_v0, %v189_v61  ;;  %v203_v61 = vld [vmem:[%s1355_s30 + $0xf8] sm:$0xff] }
  0x25   : > { %v392_v13 = vmax.f32 %v328_v3, 0.0  ;;  %1144 = vst [vmem:[%s1402_s8 + $0x20] sm:$0xff] %v1004_v6   ;;  %v1009_v16 = vpack.c.bf16 %v389_v7, %v388_v62  ;;  %v330_v17 = vadd.f32 %v1360_v1, %v259_v9  ;;  %v261_v18 = vmul.f32 %v1350_v0, %v190_v4  ;;  %v204_v4 = vld [vmem:[%s1355_s30 + $0x100] sm:$0xff]  ;;  %v205_v9 = vld [vmem:[%s1355_s30 + $0x108] sm:$0xff] }
  0x26   : > { %v262_v19 = vmul.f32 %v1350_v0, %v191_v5  ;;  %v1014_v21 = vpack.c.bf16 %v391_v11, %v390_v8  ;;  %v393_v22 = vmax.f32 %v329_v12, 0.0  ;;  %v331_v23 = vadd.f32 %v1360_v1, %v260_v14  ;;  %v206_v14 = vld [vmem:[%s1355_s30 + $0x110] sm:$0xff] }
  0x27   : > { %v263_v24 = vmul.f32 %v1350_v0, %v192_v10  ;;  %1145 = vst [vmem:[%s1402_s8 + $0x28] sm:$0xff] %v1009_v16   ;;  %v394_v26 = vmax.f32 %v330_v17, 0.0  ;;  %v332_v27 = vadd.f32 %v1360_v1, %v261_v18  ;;  %v264_v29 = vmul.f32 %v1350_v0, %v193_v15  ;;  %v207_v15 = vld [vmem:[%s1355_s30 + $0x118] sm:$0xff] }
  0x28   : > { %v333_v28 = vadd.f32 %v1360_v1, %v262_v19  ;;  %1146 = vst [vmem:[%s1402_s8 + $0x30] sm:$0xff] %v1014_v21   ;;  %v1019_v31 = vpack.c.bf16 %v393_v22, %v392_v13  ;;  %v395_v32 = vmax.f32 %v331_v23, 0.0  ;;  %v265_v34 = vmul.f32 %v1350_v0, %v194_v20  ;;  %v208_v20 = vld [vmem:[%s1355_s30 + $0x120] sm:$0xff] }
  0x29   : > { %v334_v33 = vadd.f32 %v1360_v1, %v263_v24  ;;  %v396_v36 = vmax.f32 %v332_v27, 0.0  ;;  %v335_v38 = vadd.f32 %v1360_v1, %v264_v29  ;;  %v266_v39 = vmul.f32 %v1350_v0, %v195_v25  ;;  %v209_v25 = vld [vmem:[%s1355_s30 + $0x128] sm:$0xff] }
  0x2a   : > { %v397_v37 = vmax.f32 %v333_v28, 0.0  ;;  %1147 = vst [vmem:[%s1402_s8 + $0x38] sm:$0xff] %v1019_v31   ;;  %v1024_v42 = vpack.c.bf16 %v395_v32, %v394_v26  ;;  %v336_v44 = vadd.f32 %v1360_v1, %v265_v34  ;;  %v267_v45 = vmul.f32 %v1350_v0, %v196_v30  ;;  %v210_v30 = vld [vmem:[%s1355_s30 + $0x130] sm:$0xff] }
  0x2b   : > { %v398_v43 = vmax.f32 %v334_v33, 0.0  ;;  %v399_v48 = vmax.f32 %v335_v38, 0.0  ;;  %v337_v49 = vadd.f32 %v1360_v1, %v266_v39  ;;  %v268_v50 = vmul.f32 %v1350_v0, %v197_v35  ;;  %v211_v35 = vld [vmem:[%s1355_s30 + $0x138] sm:$0xff] }
  0x2c   : > { %v1029_v47 = vpack.c.bf16 %v397_v37, %v396_v36  ;;  %1148 = vst [vmem:[%s1402_s8 + $0x40] sm:$0xff] %v1024_v42   ;;  %v400_v52 = vmax.f32 %v336_v44, 0.0  ;;  %v338_v53 = vadd.f32 %v1360_v1, %v267_v45  ;;  %v269_v54 = vmul.f32 %v1350_v0, %v198_v40  ;;  %v212_v40 = vld [vmem:[%s1355_s30 + $0x140] sm:$0xff]  ;;  %v213_v45 = vld [vmem:[%s1355_s30 + $0x148] sm:$0xff] }
  0x2d   : > { %v270_v55 = vmul.f32 %v1350_v0, %v199_v41  ;;  %v1034_v57 = vpack.c.bf16 %v399_v48, %v398_v43  ;;  %v401_v58 = vmax.f32 %v337_v49, 0.0  ;;  %v339_v59 = vadd.f32 %v1360_v1, %v268_v50  ;;  %v214_v50 = vld [vmem:[%s1355_s30 + $0x150] sm:$0xff] }
  0x2e   : > { %1149 = vst [vmem:[%s1402_s8 + $0x48] sm:$0xff] %v1029_v47   ;;  %v271_v60 = vmul.f32 %v1350_v0, %v200_v46  ;;  %v402_v62 = vmax.f32 %v338_v53, 0.0  ;;  %v340_v63 = vadd.f32 %v1360_v1, %v269_v54  ;;  %v272_v3 = vmul.f32 %v1350_v0, %v201_v51  ;;  %v215_v51 = vld [vmem:[%s1355_s30 + $0x158] sm:$0xff] }
  0x2f   : > { %v341_v2 = vadd.f32 %v1360_v1, %v270_v55  ;;  %1150 = vst [vmem:[%s1402_s8 + $0x50] sm:$0xff] %v1034_v57   ;;  %v1039_v5 = vpack.c.bf16 %v401_v58, %v400_v52  ;;  %v403_v6 = vmax.f32 %v339_v59, 0.0  ;;  %v273_v8 = vmul.f32 %v1350_v0, %v202_v56  ;;  %v216_v56 = vld [vmem:[%s1355_s30 + $0x160] sm:$0xff] }
  0x30   : > { %v342_v7 = vadd.f32 %v1360_v1, %v271_v60  ;;  %v404_v10 = vmax.f32 %v340_v63, 0.0  ;;  %v343_v12 = vadd.f32 %v1360_v1, %v272_v3  ;;  %v274_v13 = vmul.f32 %v1350_v0, %v203_v61  ;;  %v217_v61 = vld [vmem:[%s1355_s30 + $0x168] sm:$0xff] }
  0x31   : > { %v405_v11 = vmax.f32 %v341_v2, 0.0  ;;  %1151 = vst [vmem:[%s1402_s8 + $0x58] sm:$0xff] %v1039_v5   ;;  %v1044_v16 = vpack.c.bf16 %v403_v6, %v402_v62  ;;  %v344_v18 = vadd.f32 %v1360_v1, %v273_v8  ;;  %v275_v19 = vmul.f32 %v1350_v0, %v204_v4  ;;  %v218_v4 = vld [vmem:[%s1355_s30 + $0x170] sm:$0xff] }
  0x32   : > { %v406_v17 = vmax.f32 %v342_v7, 0.0  ;;  %v407_v22 = vmax.f32 %v343_v12, 0.0  ;;  %v345_v23 = vadd.f32 %v1360_v1, %v274_v13  ;;  %v276_v24 = vmul.f32 %v1350_v0, %v205_v9  ;;  %v219_v9 = vld [vmem:[%s1355_s30 + $0x178] sm:$0xff] }
  0x33   : > { %v1049_v21 = vpack.c.bf16 %v405_v11, %v404_v10  ;;  %1152 = vst [vmem:[%s1402_s8 + $0x60] sm:$0xff] %v1044_v16   ;;  %v408_v26 = vmax.f32 %v344_v18, 0.0  ;;  %v346_v27 = vadd.f32 %v1360_v1, %v275_v19  ;;  %v277_v28 = vmul.f32 %v1350_v0, %v206_v14  ;;  %v220_v14 = vld [vmem:[%s1355_s30 + $0x180] sm:$0xff]  ;;  %v221_v19 = vld [vmem:[%s1355_s30 + $0x188] sm:$0xff] }
  0x34   : > { %v278_v29 = vmul.f32 %v1350_v0, %v207_v15  ;;  %v1054_v31 = vpack.c.bf16 %v407_v22, %v406_v17  ;;  %v409_v32 = vmax.f32 %v345_v23, 0.0  ;;  %v347_v33 = vadd.f32 %v1360_v1, %v276_v24  ;;  %v222_v24 = vld [vmem:[%s1355_s30 + $0x190] sm:$0xff] }
  0x35   : > { %1153 = vst [vmem:[%s1402_s8 + $0x68] sm:$0xff] %v1049_v21   ;;  %v279_v34 = vmul.f32 %v1350_v0, %v208_v20  ;;  %v410_v36 = vmax.f32 %v346_v27, 0.0  ;;  %v348_v37 = vadd.f32 %v1360_v1, %v277_v28  ;;  %v280_v39 = vmul.f32 %v1350_v0, %v209_v25  ;;  %v223_v25 = vld [vmem:[%s1355_s30 + $0x198] sm:$0xff] }
  0x36   : > { %v349_v38 = vadd.f32 %v1360_v1, %v278_v29  ;;  %1154 = vst [vmem:[%s1402_s8 + $0x70] sm:$0xff] %v1054_v31   ;;  %v1059_v41 = vpack.c.bf16 %v409_v32, %v408_v26  ;;  %v411_v42 = vmax.f32 %v347_v33, 0.0  ;;  %v281_v44 = vmul.f32 %v1350_v0, %v210_v30  ;;  %v224_v30 = vld [vmem:[%s1355_s30 + $0x1a0] sm:$0xff] }
  0x37   : > { %v350_v43 = vadd.f32 %v1360_v1, %v279_v34  ;;  %v412_v46 = vmax.f32 %v348_v37, 0.0  ;;  %v351_v48 = vadd.f32 %v1360_v1, %v280_v39  ;;  %v282_v49 = vmul.f32 %v1350_v0, %v211_v35  ;;  %v225_v35 = vld [vmem:[%s1355_s30 + $0x1a8] sm:$0xff] }
  0x38   : > { %v413_v47 = vmax.f32 %v349_v38, 0.0  ;;  %1155 = vst [vmem:[%s1402_s8 + $0x78] sm:$0xff] %v1059_v41   ;;  %v1064_v52 = vpack.c.bf16 %v411_v42, %v410_v36  ;;  %v352_v54 = vadd.f32 %v1360_v1, %v281_v44  ;;  %v283_v55 = vmul.f32 %v1350_v0, %v212_v40  ;;  %v226_v40 = vld [vmem:[%s1355_s30 + $0x1b0] sm:$0xff] }
  0x39   : > { %v414_v53 = vmax.f32 %v350_v43, 0.0  ;;  %v415_v58 = vmax.f32 %v351_v48, 0.0  ;;  %v353_v59 = vadd.f32 %v1360_v1, %v282_v49  ;;  %v284_v60 = vmul.f32 %v1350_v0, %v213_v45  ;;  %v227_v45 = vld [vmem:[%s1355_s30 + $0x1b8] sm:$0xff] }
  0x3a   : > { %v1069_v57 = vpack.c.bf16 %v413_v47, %v412_v46  ;;  %1156 = vst [vmem:[%s1402_s8 + $0x80] sm:$0xff] %v1064_v52   ;;  %v416_v62 = vmax.f32 %v352_v54, 0.0  ;;  %v354_v63 = vadd.f32 %v1360_v1, %v283_v55  ;;  %v285_v2 = vmul.f32 %v1350_v0, %v214_v50  ;;  %v228_v50 = vld [vmem:[%s1355_s30 + $0x1c0] sm:$0xff]  ;;  %v229_v55 = vld [vmem:[%s1355_s30 + $0x1c8] sm:$0xff] }
  0x3b   : > { %v286_v3 = vmul.f32 %v1350_v0, %v215_v51  ;;  %v1074_v5 = vpack.c.bf16 %v415_v58, %v414_v53  ;;  %v417_v6 = vmax.f32 %v353_v59, 0.0  ;;  %v355_v7 = vadd.f32 %v1360_v1, %v284_v60  ;;  %v230_v60 = vld [vmem:[%s1355_s30 + $0x1d0] sm:$0xff] }
  0x3c   : > { %1157 = vst [vmem:[%s1402_s8 + $0x88] sm:$0xff] %v1069_v57   ;;  %v287_v8 = vmul.f32 %v1350_v0, %v216_v56  ;;  %v418_v10 = vmax.f32 %v354_v63, 0.0  ;;  %v356_v11 = vadd.f32 %v1360_v1, %v285_v2  ;;  %v288_v13 = vmul.f32 %v1350_v0, %v217_v61  ;;  %v231_v61 = vld [vmem:[%s1355_s30 + $0x1d8] sm:$0xff] }
  0x3d   : > { %v357_v12 = vadd.f32 %v1360_v1, %v286_v3  ;;  %1158 = vst [vmem:[%s1402_s8 + $0x90] sm:$0xff] %v1074_v5   ;;  %v1079_v15 = vpack.c.bf16 %v417_v6, %v416_v62  ;;  %v419_v16 = vmax.f32 %v355_v7, 0.0  ;;  %v289_v18 = vmul.f32 %v1350_v0, %v218_v4  ;;  %v232_v4 = vld [vmem:[%s1355_s30 + $0x1e0] sm:$0xff] }
  0x3e   : > { %v358_v17 = vadd.f32 %v1360_v1, %v287_v8  ;;  %v420_v20 = vmax.f32 %v356_v11, 0.0  ;;  %v359_v22 = vadd.f32 %v1360_v1, %v288_v13  ;;  %v290_v23 = vmul.f32 %v1350_v0, %v219_v9  ;;  %v233_v9 = vld [vmem:[%s1355_s30 + $0x1e8] sm:$0xff] }
  0x3f   : > { %v421_v21 = vmax.f32 %v357_v12, 0.0  ;;  %1159 = vst [vmem:[%s1402_s8 + $0x98] sm:$0xff] %v1079_v15   ;;  %v1084_v26 = vpack.c.bf16 %v419_v16, %v418_v10  ;;  %v360_v28 = vadd.f32 %v1360_v1, %v289_v18  ;;  %v291_v29 = vmul.f32 %v1350_v0, %v220_v14  ;;  %v234_v14 = vld [vmem:[%s1355_s30 + $0x1f0] sm:$0xff] }
  0x40   : > { %v422_v27 = vmax.f32 %v358_v17, 0.0  ;;  %v423_v32 = vmax.f32 %v359_v22, 0.0  ;;  %v361_v33 = vadd.f32 %v1360_v1, %v290_v23  ;;  %v292_v34 = vmul.f32 %v1350_v0, %v221_v19  ;;  %v235_v19 = vld [vmem:[%s1355_s30 + $0x1f8] sm:$0xff] }
  0x41   : > { %v1089_v31 = vpack.c.bf16 %v421_v21, %v420_v20  ;;  %1160 = vst [vmem:[%s1402_s8 + $0xa0] sm:$0xff] %v1084_v26   ;;  %v424_v36 = vmax.f32 %v360_v28, 0.0  ;;  %v362_v37 = vadd.f32 %v1360_v1, %v291_v29  ;;  %v293_v38 = vmul.f32 %v1350_v0, %v222_v24 }
  0x42   : > { %v294_v39 = vmul.f32 %v1350_v0, %v223_v25  ;;  %v1094_v41 = vpack.c.bf16 %v423_v32, %v422_v27  ;;  %v425_v42 = vmax.f32 %v361_v33, 0.0  ;;  %v363_v43 = vadd.f32 %v1360_v1, %v292_v34 }
  0x43   : > { %1161 = vst [vmem:[%s1402_s8 + $0xa8] sm:$0xff] %v1089_v31   ;;  %v295_v44 = vmul.f32 %v1350_v0, %v224_v30  ;;  %v426_v46 = vmax.f32 %v362_v37, 0.0  ;;  %v364_v47 = vadd.f32 %v1360_v1, %v293_v38  ;;  %v296_v49 = vmul.f32 %v1350_v0, %v225_v35 }
  0x44   : > { %v365_v48 = vadd.f32 %v1360_v1, %v294_v39  ;;  %1162 = vst [vmem:[%s1402_s8 + $0xb0] sm:$0xff] %v1094_v41   ;;  %v1099_v51 = vpack.c.bf16 %v425_v42, %v424_v36  ;;  %v427_v52 = vmax.f32 %v363_v43, 0.0  ;;  %v297_v54 = vmul.f32 %v1350_v0, %v226_v40 }
  0x45   : > { %v366_v53 = vadd.f32 %v1360_v1, %v295_v44  ;;  %v428_v56 = vmax.f32 %v364_v47, 0.0  ;;  %v367_v58 = vadd.f32 %v1360_v1, %v296_v49  ;;  %v298_v59 = vmul.f32 %v1350_v0, %v227_v45 }
  0x46   : > { %v429_v57 = vmax.f32 %v365_v48, 0.0  ;;  %1163 = vst [vmem:[%s1402_s8 + $0xb8] sm:$0xff] %v1099_v51   ;;  %v1104_v62 = vpack.c.bf16 %v427_v52, %v426_v46  ;;  %v368_v2 = vadd.f32 %v1360_v1, %v297_v54  ;;  %v299_v3 = vmul.f32 %v1350_v0, %v228_v50 }
  0x47   : > { %v430_v63 = vmax.f32 %v366_v53, 0.0  ;;  %v431_v6 = vmax.f32 %v367_v58, 0.0  ;;  %v369_v7 = vadd.f32 %v1360_v1, %v298_v59  ;;  %v300_v8 = vmul.f32 %v1350_v0, %v229_v55 }
  0x48   : > { %v1109_v5 = vpack.c.bf16 %v429_v57, %v428_v56  ;;  %1164 = vst [vmem:[%s1402_s8 + $0xc0] sm:$0xff] %v1104_v62   ;;  %v432_v10 = vmax.f32 %v368_v2, 0.0  ;;  %v370_v11 = vadd.f32 %v1360_v1, %v299_v3  ;;  %v301_v12 = vmul.f32 %v1350_v0, %v230_v60 }
  0x49   : > { %v302_v13 = vmul.f32 %v1350_v0, %v231_v61  ;;  %v1114_v15 = vpack.c.bf16 %v431_v6, %v430_v63  ;;  %v433_v16 = vmax.f32 %v369_v7, 0.0  ;;  %v371_v17 = vadd.f32 %v1360_v1, %v300_v8 }
  0x4a   : > { %1165 = vst [vmem:[%s1402_s8 + $0xc8] sm:$0xff] %v1109_v5   ;;  %v303_v18 = vmul.f32 %v1350_v0, %v232_v4  ;;  %v434_v20 = vmax.f32 %v370_v11, 0.0  ;;  %v372_v21 = vadd.f32 %v1360_v1, %v301_v12  ;;  %v304_v23 = vmul.f32 %v1350_v0, %v233_v9 }
  0x4b   : > { %v373_v22 = vadd.f32 %v1360_v1, %v302_v13  ;;  %1166 = vst [vmem:[%s1402_s8 + $0xd0] sm:$0xff] %v1114_v15   ;;  %v1119_v24 = vpack.c.bf16 %v433_v16, %v432_v10  ;;  %v435_v25 = vmax.f32 %v371_v17, 0.0  ;;  %v305_v27 = vmul.f32 %v1350_v0, %v234_v14 }
  0x4c   : > { %v374_v26 = vadd.f32 %v1360_v1, %v303_v18  ;;  %v436_v28 = vmax.f32 %v372_v21, 0.0  ;;  %v375_v30 = vadd.f32 %v1360_v1, %v304_v23  ;;  %v306_v31 = vmul.f32 %v1350_v0, %v235_v19 }
  0x4d   : > { %v437_v29 = vmax.f32 %v373_v22, 0.0  ;;  %1167 = vst [vmem:[%s1402_s8 + $0xd8] sm:$0xff] %v1119_v24   ;;  %v1124_v32 = vpack.c.bf16 %v435_v25, %v434_v20  ;;  %v376_v34 = vadd.f32 %v1360_v1, %v305_v27 }
  0x4e   : > { %v438_v33 = vmax.f32 %v374_v26, 0.0  ;;  %v439_v36 = vmax.f32 %v375_v30, 0.0  ;;  %v377_v37 = vadd.f32 %v1360_v1, %v306_v31 }
  0x4f   : > { %v1129_v35 = vpack.c.bf16 %v437_v29, %v436_v28  ;;  %1168 = vst [vmem:[%s1402_s8 + $0xe0] sm:$0xff] %v1124_v32   ;;  %v440_v38 = vmax.f32 %v376_v34, 0.0 }
  0x50   : > { %v1134_v39 = vpack.c.bf16 %v439_v36, %v438_v33  ;;  %v441_v0 = vmax.f32 %v377_v37, 0.0 }
  0x51   : > { %1169 = vst [vmem:[%s1402_s8 + $0xe8] sm:$0xff] %v1129_v35  }
  0x52   : > { %1170 = vst [vmem:[%s1402_s8 + $0xf0] sm:$0xff] %v1134_v39   ;;  %v1139_v1 = vpack.c.bf16 %v441_v0, %v440_v38 }
  0x54   : > { %1171 = vst [vmem:[%s1402_s8 + $0xf8] sm:$0xff] %v1139_v1  }
  0x55   : > { %1226 = shalt.err (!%p1223_p3)
}
  0x56   : > { %s1227_s27 = scalar_lea.hbm %s1597_s19, 4096  ;;  %s1231_s30 = scalar_lea.hbm %s1648_s3, 16384 }
  0x57   : > { %p1228_p4 = scmp.ne.s32.totalorder %s1597_s19, %s1227_s27  ;;  %p1232_p9 = scmp.lt.s32.totalorder %s1597_s19, %s1648_s3 }
  0x58   : > { %p1233_p10 = scmp.lt.s32.totalorder %s1231_s30, %s1227_s27 }
  0x59   : > { %p1229_p7 = pnand %p1228_p4, %p1336_p5 }
  0x5a   : > { %p1234_p11 = por %p1233_p10, %p1232_p9 }
  0x5b   : > { %p1230_p8 = pneg %p1229_p7 }
  0x5d   : > { %p1235_p12 = pnand %p1234_p11, %p1230_p8 }
  0x5f   : > { %1238 = shalt.err (!%p1235_p12)
}
  0x60   : > { %s1276_s6 = smov 64   ;;  %s1277_s7 = smov 4  }
  0x61   : > { %1172 = dma.vmem_to_hbm [thread:$0]  (%p1336_p5), %s1599_s10, 4096, %s1597_s19, %s1605_s16, %s1276_s6, %s1276_s6, %s1277_s7  }
  0x62 PF: > { %p1178_p13 = scmp.ge.s32.totalorder %s1273_s15, 2  ;;  %s791_s8 = sand.u32 1, %s1261_s12  }
  0x63   : > { %s792_s9 = scalar_lea.sflag [#allocation3], %s791_s8 }
  0x64   : > { %p1175_p0 = pnand %p1178_p13, %p1340_p6 }
  0x66   : > { %p1176_p1 = pneg %p1175_p0 }
  0x68   : > { %1256 = dma.done.wait (%p1176_p1), %s792_s9, 4096  }
  0x69   : > { %1258 = vsyncadd (%p1176_p1), %s792_s9, 4294963200  ;;  %p13_p2 = scmp.ge.s32.totalorder %s1323_s18, 6   ;;  %s1651_s12 = smov %s1265_s13 }
  0x6a   : > { %s1652_s13 = smov %s1269_s14  ;;  %s1653_s14 = smov %s1334_s21 }
  0x6b   : > { %s1654_s15 = smov %s1323_s18  ;;  %15 = sbr.rel (!%p13_p2) target bundleno = 3 (0x3), region = 67 }
  0x70   :  { %797 = vsyncpa [#allocation3], 1 }
  0x71   :  { %799 = vsyncpa [#allocation3 + $0x1], 1 }

// kernel: convblock_forward.2
= control target key start
LH: loop header
LB: loop body
LE: loop exit
PB: predicated region body
PF: predicated region fallthrough
CT: control target
= control target key end

     0   :  { %s1513_s21 = smov 0   ;;  %s1515_s22 = smov 0   ;;  %s1715_s0 = inlined_call_operand.vmem [shape: bf16[2,34,34,3], index: 0, kind: input, shape index: {}, may-alias: {0,1,2}]   ;;  %s1716_s1 = inlined_call_operand.vmem [shape: bf16[2,34,34,3], index: 1, kind: input, shape index: {}, may-alias: {0,1,2}]   ;;  %s1717_s2 = inlined_call_operand.vmem [shape: bf16[2,34,34,3], index: 2, kind: input, shape index: {}, may-alias: {0,1,2}]   ;;  %s1718_s3 = inlined_call_operand.vmem [shape: bf16[3,3,3,128], index: 3, kind: input, shape index: {}]   ;;  %s1719_s4 = inlined_call_operand.vmem [shape: f32[2,32,32,128], index: 4, kind: output, shape index: {0}]   ;;  %s1720_s5 = inlined_call_operand.vmem [shape: f32[1,128], index: 5, kind: output, shape index: {1}]   ;;  %s1721_s6 = inlined_call_operand.vmem [shape: f32[1,128], index: 6, kind: output, shape index: {2}]  }
   0x1   :  { %1722 = sst [smem:[#allocation3_spill]] %s1715_s0  ;;  %s1517_s23 = smov 0  }
   0x2   :  { %s1519_s24 = smov 0   ;;  %s1521_s25 = smov 0  }
   0x3 LB: > { %s26_s26 = sadd.s32 1, %s1466_s23  ;;  %s29_s27 = sadd.s32 1, %s1470_s24  ;;  %s1474_s25 = sphi %s1521_s25, %s17_s25   ;;  %s1470_s24 = sphi %s1519_s24, %s1729_s24   ;;  %s1466_s23 = sphi %s1517_s23, %s1728_s23   ;;  %s1462_s22 = sphi %s1515_s22, %s1727_s22   ;;  %s1458_s21 = sphi %s1513_s21, %s1726_s21  }
   0x4   : > { %p27_p0 = scmp.ge.s32.totalorder %s26_s26, 32  ;;  %p1256_p1 = scmp.ge.s32.totalorder %s1474_s25, 1 }
   0x5   : > { %p267_p2 = scmp.lt.s32.totalorder %s1474_s25, 65 }
   0x6   : > { %s1731_s26 = smov (%p27_p0, %s26_s26), 0  ;;  %s1733_s27 = smov (!%p27_p0, %s29_s27), %s1470_s24 }
   0x7   : > { %p268_p3 = pnand %p1256_p1, %p267_p2  ;;  %p31_p4 = scmp.ge.s32.totalorder %s1733_s27, 2 }
   0x8   : > { %p325_p5 = scmp.lt.s32.totalorder (!%p268_p3), %s1462_s22, 1  ;;  %p327_p6 = scmp.lt.s32.totalorder (!%p268_p3), %s1458_s21, 33 }
   0x9   : > { %s1735_s27 = smov (%p31_p4, %s1733_s27), 0  ;;  %271 = sbr.rel (%p268_p3) target bundleno = 302 (0x12e), region = 36 }
   0xa   : > { %1723 = sst [smem:[#allocation2_spill]] %s1735_s27  ;;  %s334_s28 = sadd.s32 (!%p268_p3), 1, %s1458_s21 }
   0xb   : > { %s345_s29 = sadd.s32 (!%p268_p3), 2, %s1458_s21  ;;  %p337_p7 = scmp.lt.s32.totalorder (!%p268_p3), %s334_s28, 33 }
   0xc   : > { %p348_p8 = scmp.lt.s32.totalorder (!%p268_p3), %s345_s29, 33  ;;  %s1724_s0 = sld [smem:[#allocation3_spill]] (!%p268_p3) }
   0xd   : > { %p358_p9 = scmp.lt.s32.totalorder (!%p268_p3), %s1458_s21, 31  ;;  %p366_p10 = scmp.eq.s32.totalorder (!%p268_p3), %s1462_s22, 0 }
   0xe   : > { %s326_s30 = scalar_select %p325_p5, %s1462_s22, 1 }
   0xf   : > { %s328_s7 = scalar_select %p327_p6, %s1458_s21, 33 }
  0x10   : > { %s1382_s8 = smul.u32 170, %s326_s30  ;;  %s1737_s28 = smov (!%p337_p7, %s334_s28), 33 }
  0x11   : > { %s1381_s9 = smul.u32 5, %s328_s7  ;;  %p367_p11 = scmp.eq.s32.totalorder %s1458_s21, 0 }
  0x12   : > { %s1383_s12 = smul.u32 5, %s1737_s28  ;;  %s1261_s7 = sshll.u32 %s326_s30, 7 }
  0x13   : > { %s331_s10 = sadd.s32 %s1382_s8, %s1381_s9  ;;  %s1739_s29 = smov (!%p348_p8, %s345_s29), 33 }
  0x14   : > { %s1257_s11 = sshll.u32 %s331_s10, 2  ;;  %s341_s16 = sadd.s32 %s1383_s12, %s1382_s8 }
  0x15   : > { %s1556_s15 = scalar_lea.vmem %s1724_s0, %s1257_s11  ;;  %s1258_s17 = sshll.u32 %s341_s16, 2 }
  0x16   : > { %s1564_s20 = scalar_lea.vmem %s1716_s1, %s1258_s17  ;;  %s1741_s21 = smov (!%p358_p9, %s1458_s21), 31 }
  0x17   : > { %s1384_s9 = smul.u32 5, %s1739_s29  ;;  %p368_p12 = pnand %p367_p11, %p366_p10 }
  0x18   : > { %s1260_s28 = sshll.u32 %s1741_s21, 2 }
  0x19   : > { %s352_s10 = sadd.s32 %s1384_s9, %s1382_s8  ;;  %s362_s13 = sadd.s32 %s1261_s7, %s1260_s28 }
  0x1a   : > { %s1259_s11 = sshll.u32 %s352_s10, 2  ;;  %s1262_s14 = sshll.u32 %s362_s13, 3 }
  0x1b   : > { %s1570_s22 = scalar_lea.vmem %s1717_s2, %s1259_s11  ;;  %s1575_s17 = scalar_lea.vmem %s1719_s4, %s1262_s14 }
  0x1c   : > { %371 = sbr.rel (%p368_p12) target bundleno = 35 (0x23), region = 40 }
  0x21   : > { %v1476_v0 = vmov 0.0  }
  0x22   : > { %372 = vst [vmem:[%s1720_s5] sm:$0x1] %v1476_v0  ;;  %373 = vst [vmem:[%s1721_s6] sm:$0x1] %v1476_v0 }
  0x23 PF: > { %v1263_v1 = vld [vmem:[%s1718_s3 + $0x2] sm:$0x3]  ;;  %vm423_vm0 = vcmask 1040384   ;;  %vm424_vm1 = vcmask 1041408   ;;  %v1477_v3 = vmov 65535   ;;  %v1591_v6 = vld [vmem:[%s1556_s15 + $0x8] sm:$0xff]  }
  0x24   : > { %v1427_v2 = vld [vmem:[%s1556_s15] sm:$0xff]   ;;  %v425_v4 = vsel %vm423_vm0, 4294967295, %v1477_v3  ;;  %vm395_vm2 = vsmask.f32 7424  ;;  %v404_v12 = vshll.u32 %v1591_v6, 16  ;;  %v408_v13 = vshrl.u32 %v1591_v6, 16 }
  0x25   : > { %v379_v5 = vld [vmem:[%s1718_s3] sm:$0x3]  ;;  %v1593_v7 = vsel %vm424_vm1, %v425_v4, 0  ;;  %v397_v8 = vshrl.u32 %v1427_v2, 16  ;;  %v399_v11 = vshll.u32 %v1427_v2, 16  ;;  %vm416_vm3 = vcmask 23552  }
  0x26   : > { %v428_v9 = vand.u32 %v1263_v1, %v1593_v7  ;;  %v484_v10 = vand.u32 %v1593_v7, %v379_v5  ;;  %v1271_v14 = vld [vmem:[%s1718_s3 + $0x4] sm:$0x3]  ;;  %vm537_vm4 = vcmask 1046528   ;;  %v1429_v18 = vld [vmem:[%s1556_s15 + $0x10] ss:$0 sps:$4 sm:$0x11]   ;;  %1335 = vmatprep.mubr.msk.bf16.mxu1 %vm416_vm3, %v1427_v2 }
  0x27   : > { %v1430_v15 = vld [vmem:[%s1564_s20] sm:$0xff]   ;;  %v401_v16 = vrot.slane %v399_v11, 1  ;;  %v550_v17 = vand.u32 %v1271_v14, %v1593_v7  ;;  %v406_v19 = vrot.slane %v404_v12, 1  ;;  %v538_v21 = vrot.slane %v1427_v2, 1  ;;  %v1610_v23 = vld [vmem:[%s1564_s20 + $0x8] sm:$0xff]  }
  0x28   : > { %1327 = vmatprep.subr.bf16.mxu0 %v428_v9  ;;  %1333 = vmatprep.subr.bf16.mxu1 %v484_v10  ;;  %v1274_v20 = vld [vmem:[%s1718_s3 + $0x6] sm:$0x3]  ;;  %v539_v22 = vrot.slane %v1591_v6, 1  ;;  %v412_v25 = vshll.u32 %v1429_v18, 16  ;;  %v1279_v28 = vld [vmem:[%s1718_s3 + $0x8] sm:$0x3] }
  0x29   : > { %1328 = vmatpush3.bf16.msra.mxu0 %v428_v9  ;;  %1334 = vmatpush3.bf16.msra.mxu1 %v484_v10  ;;  %v402_v24 = vor.u32 %v401_v16, %v397_v8  ;;  %v629_v26 = vand.u32 %v1274_v20, %v1593_v7  ;;  %v410_v27 = vor.u32 %v408_v13, %v406_v19  ;;  %v1283_v33 = vld [vmem:[%s1718_s3 + $0xa] sm:$0x3]  ;;  %v689_v35 = vshrl.u32 %v1430_v15, 16  ;;  %v1629_v38 = vld [vmem:[%s1570_s22] sm:$0xff]   ;;  %v1291_v45 = vld [vmem:[%s1718_s3 + $0xe] sm:$0x3] }
  0x2a   : > { %1339 = vmatprep.subr.bf16.mxu0 %v550_v17  ;;  %v414_v30 = vrot.slane %v412_v25, 1  ;;  %v540_v31 = vsel %vm537_vm4, %v538_v21, %v539_v22  ;;  %v714_v32 = vand.u32 %v1279_v28, %v1593_v7  ;;  %v783_v34 = vand.u32 %v1283_v33, %v1593_v7  ;;  %v1432_v42 = vld [vmem:[%s1564_s20 + $0x10] ss:$0 sps:$4 sm:$0x11]   ;;  %v1636_v43 = vld [vmem:[%s1570_s22 + $0x8] sm:$0xff]  }
  0x2b   : > { %v407_v29 = vsel %vm395_vm2, %v402_v24, %v406_v19  ;;  %1345 = vmatprep.subr.bf16.mxu1 %v629_v26  ;;  %v691_v36 = vshll.u32 %v1430_v15, 16  ;;  %v695_v37 = vshll.u32 %v1610_v23, 16  ;;  %v771_v40 = vrot.slane %v1430_v15, 1  ;;  %v1286_v51 = vld [vmem:[%s1718_s3 + $0xc] sm:$0x3] }
  0x2c   : > { %1336 = vmatmul.mubr.msk.bf16.vlgmr.msra.gmra.mxu1 %vm416_vm3, %v1591_v6  ;;  %1329 = vmatprep.mubr.msk.bf16.mxu0 %vm416_vm3, %v407_v29  ;;  %v415_v39 = vsel %vm395_vm2, %v410_v27, %v414_v30  ;;  %v772_v41 = vrot.slane %v1610_v23, 1  ;;  %v541_v46 = vrot.slane %v1429_v18, 1  ;;  %v924_v49 = vshll.u32 %v1629_v38, 16  ;;  %v1435_v62 = vld [vmem:[%s1570_s22 + $0x10] ss:$0 sps:$4 sm:$0x11]  }
  0x2d   : > { %1346 = vmatpush3.bf16.msra.mxu1 %v629_v26  ;;  %1347 = vmatprep.mubr.msk.bf16.mxu1 %vm416_vm3, %v1430_v15  ;;  %v693_v44 = vrot.slane %v691_v36, 1  ;;  %v697_v48 = vrot.slane %v695_v37, 1  ;;  %v947_v52 = vand.u32 %v1291_v45, %v1593_v7  ;;  %v922_v53 = vshrl.u32 %v1629_v38, 16  ;;  %v1295_v8 = vld [vmem:[%s1718_s3 + $0x10] sm:$0x3] }
  0x2e   : > { %1330 = vmatmul.mubr.msk.bf16.vlgmr.msra.gmra.mxu0 %vm416_vm3, %v415_v39  ;;  %1357 = vmatprep.subr.bf16.mxu1 %v783_v34  ;;  %v773_v50 = vsel %vm537_vm4, %v771_v40, %v772_v41  ;;  %v928_v54 = vshll.u32 %v1636_v43, 16  ;;  %v926_v55 = vrot.slane %v924_v49, 1  ;;  %v542_v56 = vsel %vm537_vm4, %v539_v22, %v541_v46 }
  0x2f   : > { %1340 = vmatpush3.bf16.msra.mxu0 %v550_v17  ;;  %1341 = vmatprep.mubr.msk.bf16.mxu0 %vm416_vm3, %v540_v31  ;;  %v694_v47 = vor.u32 %v693_v44, %v689_v35  ;;  %v699_v57 = vshrl.u32 %v1610_v23, 16  ;;  %v703_v58 = vshll.u32 %v1432_v42, 16  ;;  %v862_v60 = vand.u32 %v1286_v51, %v1593_v7 }
  0x30   : > { %1351 = vmatprep.subr.bf16.mxu0 %v714_v32  ;;  %v774_v61 = vrot.slane %v1432_v42, 1  ;;  %v927_v63 = vor.u32 %v926_v55, %v922_v53  ;;  %v930_v0 = vrot.slane %v928_v54, 1  ;;  %v932_v4 = vshrl.u32 %v1636_v43, 16 }
  0x31   : > { %v698_v59 = vsel %vm395_vm2, %v694_v47, %v697_v48  ;;  %v701_v1 = vor.u32 %v699_v57, %v697_v48  ;;  %v705_v2 = vrot.slane %v703_v58, 1  ;;  %v936_v5 = vshll.u32 %v1435_v62, 16 }
  0x32   : > { %v775_v3 = vsel %vm537_vm4, %v772_v41, %v774_v61  ;;  %v931_v6 = vsel %vm395_vm2, %v927_v63, %v930_v0  ;;  %v934_v10 = vor.u32 %v932_v4, %v930_v0  ;;  %v1016_v11 = vand.u32 %v1295_v8, %v1593_v7 }
  0x33   : > { %v706_v9 = vsel %vm395_vm2, %v701_v1, %v705_v2  ;;  %v938_v12 = vrot.slane %v936_v5, 1  ;;  %v1004_v14 = vrot.slane %v1629_v38, 1  ;;  %v1005_v15 = vrot.slane %v1636_v43, 1 }
  0x34   : > { %1348 = vmatmul.mubr.msk.bf16.vlgmr.msra.gmra.mxu1 %vm416_vm3, %v1610_v23  ;;  %v1007_v7 = vrot.slane %v1435_v62, 1 }
  0x35   : > { %1358 = vmatpush3.bf16.msra.mxu1 %v783_v34  ;;  %1359 = vmatprep.mubr.msk.bf16.mxu1 %vm416_vm3, %v773_v50  ;;  %v939_v13 = vsel %vm395_vm2, %v934_v10, %v938_v12  ;;  %v1006_v16 = vsel %vm537_vm4, %v1004_v14, %v1005_v15 }
  0x36   : > { %1369 = vmatprep.subr.bf16.mxu1 %v947_v52  ;;  %1342 = vmatmul.mubr.msk.bf16.vlgmr.msra.gmra.mxu0 %vm416_vm3, %v542_v56  ;;  %v1008_v17 = vsel %vm537_vm4, %v1005_v15, %v1007_v7 }
  0x37   : > { %1352 = vmatpush3.bf16.msra.mxu0 %v714_v32  ;;  %1353 = vmatprep.mubr.msk.bf16.mxu0 %vm416_vm3, %v698_v59 }
  0x38   : > { %1363 = vmatprep.subr.bf16.mxu0 %v862_v60 }
  0x3c   : > { %1360 = vmatmul.mubr.msk.bf16.vlgmr.msra.gmra.mxu1 %vm416_vm3, %v775_v3 }
  0x3d   : > { %1370 = vmatpush3.bf16.msra.mxu1 %v947_v52  ;;  %1371 = vmatprep.mubr.msk.bf16.mxu1 %vm416_vm3, %v931_v6 }
  0x3e   : > { %1354 = vmatmul.mubr.msk.bf16.vlgmr.msra.gmra.mxu0 %vm416_vm3, %v706_v9 }
  0x3f   : > { %1364 = vmatpush3.bf16.msra.mxu0 %v862_v60  ;;  %1365 = vmatprep.mubr.msk.bf16.mxu0 %vm416_vm3, %v1629_v38 }
  0x40   : > { %1375 = vmatprep.subr.bf16.mxu0 %v1016_v11 }
  0x44   : > { %1372 = vmatmul.mubr.msk.bf16.vlgmr.msra.gmra.mxu1 %vm416_vm3, %v939_v13 }
  0x46   : > { %1366 = vmatmul.mubr.msk.bf16.vlgmr.msra.gmra.mxu0 %vm416_vm3, %v1636_v43 }
  0x47   : > { %1376 = vmatpush3.bf16.msra.mxu0 %v1016_v11  ;;  %1377 = vmatprep.mubr.msk.bf16.mxu0 %vm416_vm3, %v1006_v16 }
  0x4e   : > { %1378 = vmatmul.mubr.msk.bf16.vlgmr.msra.gmra.mxu0 %vm416_vm3, %v1008_v17 }
  0xec   : > { %v1337_v18 = vpop.f32.mrf.mxu1 }
  0xee   : > { %v520_v19 = vpop.f32.mrf.mxu1  ;;  %v1331_v20 = vpop.f32.mrf.mxu0 }
  0xef   : > { %v529_v33 = vadd.f32 %v1337_v18, %v1331_v20 }
  0xf0   : > { %v1338_v21 = vpop.f32.mrf.mxu1  ;;  %v464_v22 = vpop.f32.mrf.mxu0 }
  0xf1   : > { %v521_v36 = vadd.f32 %v520_v19, %v464_v22 }
  0xf2   : > { %v523_v23 = vpop.f32.mrf.mxu1  ;;  %v1332_v24 = vpop.f32.mrf.mxu0 }
  0xf3   : > { %v532_v40 = vadd.f32 %v1338_v21, %v1332_v24 }
  0xf4   : > { %v1349_v25 = vpop.f32.mrf.mxu1  ;;  %v467_v26 = vpop.f32.mrf.mxu0 }
  0xf5   : > { %v524_v44 = vadd.f32 %v523_v23, %v467_v26 }
  0xf6   : > { %v665_v27 = vpop.f32.mrf.mxu1  ;;  %v1343_v28 = vpop.f32.mrf.mxu0 }
  0xf7   : > { %v603_v37 = vadd.f32 %v1343_v28, %v529_v33 }
  0xf8   : > { %v1350_v29 = vpop.f32.mrf.mxu1  ;;  %v586_v30 = vpop.f32.mrf.mxu0 }
  0xf9   : > { %v601_v41 = vadd.f32 %v586_v30, %v521_v36  ;;  %v682_v45 = vadd.f32 %v1349_v25, %v603_v37 }
  0xfa   : > { %v668_v31 = vpop.f32.mrf.mxu1  ;;  %v1344_v32 = vpop.f32.mrf.mxu0 }
  0xfb   : > { %v604_v46 = vadd.f32 %v1344_v32, %v532_v40  ;;  %v680_v49 = vadd.f32 %v665_v27, %v601_v41  ;;  %v1075_v41 = vld [vmem:[%s1720_s5] sm:$0x1] }
  0xfc   : > { %v1361_v34 = vpop.f32.mrf.mxu1  ;;  %v589_v35 = vpop.f32.mrf.mxu0 }
  0xfd   : > { %v602_v50 = vadd.f32 %v589_v35, %v524_v44  ;;  %v683_v53 = vadd.f32 %v1350_v29, %v604_v46  ;;  %v1087_v44 = vld [vmem:[%s1721_s6] sm:$0x1] }
  0xfe   : > { %v819_v38 = vpop.f32.mrf.mxu1  ;;  %v1355_v39 = vpop.f32.mrf.mxu0 }
  0xff   : > { %v767_v51 = vadd.f32 %v1355_v39, %v682_v45  ;;  %v681_v57 = vadd.f32 %v668_v31, %v602_v50 }
 0x100   : > { %v1362_v42 = vpop.f32.mrf.mxu1  ;;  %v750_v43 = vpop.f32.mrf.mxu0 }
 0x101   : > { %v765_v54 = vadd.f32 %v750_v43, %v680_v49  ;;  %v836_v58 = vadd.f32 %v1361_v34, %v767_v51 }
 0x102   : > { %v1356_v47 = vpop.f32.mrf.mxu0  ;;  %v822_v48 = vpop.f32.mrf.mxu1 }
 0x103   : > { %v768_v59 = vadd.f32 %v1356_v47, %v683_v53  ;;  %v834_v61 = vadd.f32 %v819_v38, %v765_v54 }
 0x104   : > { %v753_v52 = vpop.f32.mrf.mxu0  ;;  %v1373_v56 = vpop.f32.mrf.mxu1 }
 0x105   : > { %v766_v62 = vadd.f32 %v753_v52, %v681_v57  ;;  %v837_v2 = vadd.f32 %v1362_v42, %v768_v59 }
 0x106   : > { %v1367_v55 = vpop.f32.mrf.mxu0  ;;  %v983_v0 = vpop.f32.mrf.mxu1 }
 0x107   : > { %v915_v63 = vadd.f32 %v1367_v55, %v836_v58  ;;  %v835_v5 = vadd.f32 %v822_v48, %v766_v62 }
 0x108   : > { %v898_v60 = vpop.f32.mrf.mxu0  ;;  %v1374_v9 = vpop.f32.mrf.mxu1 }
 0x109   : > { %v913_v3 = vadd.f32 %v898_v60, %v834_v61  ;;  %v1000_v6 = vadd.f32 %v1373_v56, %v915_v63 }
 0x10a   : > { %v1368_v1 = vpop.f32.mrf.mxu0  ;;  %v986_v7 = vpop.f32.mrf.mxu1 }
 0x10b   : > { %v916_v8 = vadd.f32 %v1368_v1, %v837_v2  ;;  %v998_v11 = vadd.f32 %v983_v0, %v913_v3 }
 0x10c   : > { %v901_v4 = vpop.f32.mrf.mxu0 }
 0x10d   : > { %v914_v12 = vadd.f32 %v901_v4, %v835_v5  ;;  %v1001_v15 = vadd.f32 %v1374_v9, %v916_v8 }
 0x10e   : > { %v1379_v10 = vpop.f32.mrf.mxu0 }
 0x10f   : > { %v1069_v13 = vadd.f32 %v1379_v10, %v1000_v6  ;;  %v999_v18 = vadd.f32 %v986_v7, %v914_v12 }
 0x110   : > { %v1052_v14 = vpop.f32.mrf.mxu0 }
 0x111   : > { %1073 = vst [vmem:[%s1575_s17 + $0x10] sm:$0xff] %v1069_v13  ;;  %v1067_v16 = vadd.f32 %v1052_v14, %v998_v11  ;;  %v1090_v25 = vmul.f32 %v1069_v13, %v1069_v13 }
 0x112   : > { %v1380_v17 = vpop.f32.mrf.mxu0 }
 0x113   : > { %1071 = vst [vmem:[%s1575_s17] sm:$0xff] %v1067_v16  ;;  %v1070_v19 = vadd.f32 %v1380_v17, %v1001_v15  ;;  %v1088_v22 = vmul.f32 %v1067_v16, %v1067_v16 }
 0x114   : > { %v1055_v20 = vpop.f32.mrf.mxu0 }
 0x115   : > { %1074 = vst [vmem:[%s1575_s17 + $0x18] sm:$0xff] %v1070_v19  ;;  %v1068_v21 = vadd.f32 %v1055_v20, %v999_v18  ;;  %v1091_v28 = vmul.f32 %v1070_v19, %v1070_v19 }
 0x117   : > { %1072 = vst [vmem:[%s1575_s17 + $0x8] sm:$0xff] %v1068_v21  ;;  %v1076_v23 = vadd.f32 %v1068_v21, %v1067_v16  ;;  %v1089_v24 = vmul.f32 %v1068_v21, %v1068_v21 }
 0x119   : > { %v1077_v26 = vadd.f32 %v1076_v23, %v1069_v13  ;;  %v1092_v27 = vadd.f32 %v1089_v24, %v1088_v22 }
 0x11b   : > { %v1078_v29 = vadd.f32 %v1077_v26, %v1070_v19  ;;  %v1093_v30 = vadd.f32 %v1092_v27, %v1090_v25 }
 0x11d   : > { %v1079_v31 = vrot.slane %v1078_v29, 4  ;;  %v1094_v32 = vadd.f32 %v1093_v30, %v1091_v28 }
 0x11f   : > { %v1080_v33 = vadd.f32 %v1079_v31, %v1078_v29  ;;  %v1095_v34 = vrot.slane %v1094_v32, 4 }
 0x121   : > { %v1081_v35 = vrot.slane %v1080_v33, 2  ;;  %v1096_v36 = vadd.f32 %v1095_v34, %v1094_v32 }
 0x123   : > { %v1082_v37 = vadd.f32 %v1081_v35, %v1080_v33  ;;  %v1097_v38 = vrot.slane %v1096_v36, 2 }
 0x125   : > { %v1083_v39 = vrot.slane %v1082_v37, 1  ;;  %v1098_v40 = vadd.f32 %v1097_v38, %v1096_v36 }
 0x127   : > { %v1084_v42 = vadd.f32 %v1083_v39, %v1082_v37  ;;  %v1099_v43 = vrot.slane %v1098_v40, 1 }
 0x129   : > { %v1085_v45 = vadd.f32 %v1084_v42, %v1075_v41  ;;  %v1100_v46 = vadd.f32 %v1099_v43, %v1098_v40 }
 0x12b   : > { %1086 = vst [vmem:[%s1720_s5] sm:$0x1] %v1085_v45  ;;  %v1101_v47 = vadd.f32 %v1100_v46, %v1087_v44 }
 0x12d   : > { %1102 = vst [vmem:[%s1721_s6] sm:$0x1] %v1101_v47 }
 0x12e PF: > { %s17_s25 = sadd.s32 1, %s1474_s25   ;;  %s1725_s9 = sld [smem:[#allocation2_spill]] }
 0x12f   : > { %p14_p13 = scmp.ge.s32.totalorder %s17_s25, 66   ;;  %s1726_s21 = smov %s1466_s23 }
 0x130   : > { %s1727_s22 = smov %s1470_s24  ;;  %s1728_s23 = smov %s1731_s26 }
 0x131   :  { %16 = sbr.rel (!%p14_p13) target bundleno = 3 (0x3), region = 100 }
 0x134   : > { %s1729_s24 = smov %s1725_s9 }

</bundles_post_ra>
